<compile_context>
chip_gen: v5e
topology: v5e:2x2
jax: 0.10.0
libtpu: 0.0.40
codegen_flags: <defaults>
</compile_context>

<pallas_src>
import functools
import math

import jax
import jax.numpy as jnp
from jax.experimental import pallas as pl
from jax.experimental.pallas import tpu as pltpu


NEG_INF = -1e30  # finite "minus infinity": safe for softmax even if cast down


def _layernorm(x, w, b, eps=1e-5):
    mu = jnp.mean(x, axis=-1, keepdims=True)
    var = jnp.mean((x - mu) ** 2, axis=-1, keepdims=True)
    return (x - mu) * jax.lax.rsqrt(var + eps) * w + b


# --------------------------- chip-aware config ------------------------------ #

def _tpu_config():
    """Trace-time (host Python) chip detection.

    Returns (num_tensorcores_sharing_the_kernel, vmem_limit_bytes, gelu_bf16).
    """
    kind = ""
    try:
        kind = (jax.devices()[0].device_kind or "").lower()
    except Exception:
        pass

    is_v7 = "v7" in kind
    # Chips where a single pallas_call's "parallel" grid axes are sharded
    # across 2 TensorCores (megacore-style): v7x, v4, v5p.
    num_cores = 2 if (is_v7 or "v4" in kind or "v5p" in kind) else 1

    vmem_cap = 64 * 1024 * 1024 if is_v7 else 128 * 1024 * 1024
    try:
        info = pltpu.get_tpu_info()
        cap = getattr(info, "vmem_capacity_bytes", None)
        if cap:
            vmem_cap = int(cap)
    except Exception:
        pass

    # Never plan to the physical limit: leave headroom for compiler-internal
    # scratch and pipelining slack (≈52 MiB on v7x, ≈104 MiB on v5e/v6e).
    vmem_limit = (int(vmem_cap) * 13) // 16

    # bf16 EUP (transcendentals) exists on v6e/v7x; keep f32 sigmoid on older chips.
    gelu_bf16 = not any(t in kind for t in ("v2", "v3", "v4", "v5"))
    return num_cores, vmem_limit, gelu_bf16


def _pick_batch_tiles(B, L, W, layers, heads, num_cores, vmem_limit):
    """Smallest batch-tile count (preferring a multiple of #TensorCores) whose
    per-tile working set fits in the VMEM budget.  nt=1 on single-TC chips
    unless VMEM forces a split (avoids re-streaming the weight stack)."""
    wbytes = 12 * W * W * 2 + 18 * W * 4            # per-layer bf16 mats + f32 biases/LN

    def need(bb):
        resid = bb * L * W * 4                      # residual stream (resident output block)
        x_in = 2 * bb * L * W * 4                   # pipelined x input (double buffered)
        qkv = bb * L * 3 * W * 2                    # bf16 transient
        heads_t = 4 * bb * L * W * 2                # head-major q/k/v/o copies (bf16)
        fc = bb * L * 4 * W * 2                     # bf16 transient
        score = 2 * heads * bb * L * L * 4          # scores + exp (f32)
        return 2 * wbytes + resid + x_in + qkv + heads_t + fc + score + (2 << 20)

    divisors = [d for d in range(1, B + 1) if B % d == 0]
    preferred = [d for d in divisors if d % num_cores == 0] or divisors
    # NOTE: odd batch on a 2-TC chip falls back to nt=1 (one core idle) rather
    # than erroring — documented trade-off from the review.
    for nt in preferred:
        if need(B // nt) <= vmem_limit:
            return nt
    return B


# --------------------------------- kernel ---------------------------------- #

def gpt_layers_kernel(n_head, gelu_bf16,
                      x_ref,
                      ln1w_ref, ln1b_ref, wqkv_ref, bqkv_ref, wo_ref, bo_ref,
                      ln2w_ref, ln2b_ref, wfc_ref, bfc_ref, wpr_ref, bpr_ref,
                      out_ref):
    """One ResidualAttentionBlock per grid step.

    grid = (batch_tiles, layers).  The residual stream lives in `out_ref`
    (same output block across the layers axis -> resident in VMEM); per-layer
    weights arrive through pipelined (1, ., .) blocks indexed by the layer id.
    """
    layer = pl.program_id(1)

    @pl.when(layer == 0)
    def _():
        out_ref[...] = x_ref[...]

    Bb, L, W = out_ref.shape
    H = n_head
    Dh = W // H
    bf16 = jnp.bfloat16
    f32 = jnp.float32

    x = out_ref[...].astype(f32)              # (Bb, L, W) residual stream, f32

    # Causal mask built in-kernel (no HBM input / VMEM buffer): pad positions
    # sit after the real tokens, so causality also hides any seq padding.
    row = jax.lax.broadcasted_iota(jnp.int32, (L, L), 0)
    col = jax.lax.broadcasted_iota(jnp.int32, (L, L), 1)
    keep = col <= row                          # (L, L) bool

    # ------------------------------ attention ------------------------------ #
    h = _layernorm(x, ln1w_ref[0], ln1b_ref[0])
    qkv = (jnp.dot(h.reshape(Bb * L, W).astype(bf16), wqkv_ref[0],
                   preferred_element_type=f32) + bqkv_ref[0]).astype(bf16)
    qkv = qkv.reshape(Bb, L, 3 * W)            # bf16 (halves transient VMEM / stores)
    q = qkv[..., :W]                           # 1/sqrt(Dh) pre-folded into wqkv
    k = qkv[..., W:2 * W]
    v = qkv[..., 2 * W:]

    # Head-major batched layout (H*Bb, L, Dh); both attention einsums run
    # batched over a single leading dim (known-good Mosaic form).
    qh = jnp.concatenate([q[:, :, i * Dh:(i + 1) * Dh] for i in range(H)], axis=0)
    kh = jnp.concatenate([k[:, :, i * Dh:(i + 1) * Dh] for i in range(H)], axis=0)
    vh = jnp.concatenate([v[:, :, i * Dh:(i + 1) * Dh] for i in range(H)], axis=0)

    sc = jnp.einsum('bld,bmd->blm', qh, kh, preferred_element_type=f32)   # (H*Bb, L, L)
    sc = jnp.where(keep, sc, NEG_INF)
    m = jnp.max(sc, axis=-1, keepdims=True)
    e = jnp.exp(sc - m)
    p = (e * pl.reciprocal(jnp.sum(e, axis=-1, keepdims=True), approx=True)).astype(bf16)
    o = jnp.einsum('blm,bmd->bld', p, vh,
                   preferred_element_type=f32).astype(bf16)               # (H*Bb, L, Dh)
    attn = jnp.concatenate([o[i * Bb:(i + 1) * Bb] for i in range(H)], axis=-1)

    attn = jnp.dot(attn.reshape(Bb * L, W), wo_ref[0],
                   preferred_element_type=f32) + bo_ref[0]
    x = x + attn.reshape(Bb, L, W)

    # ------------------------------ MLP (QuickGELU) ------------------------ #
    h = _layernorm(x, ln2w_ref[0], ln2b_ref[0])
    fc = (jnp.dot(h.reshape(Bb * L, W).astype(bf16), wfc_ref[0],
                  preferred_element_type=f32) + bfc_ref[0]).astype(bf16)
    if gelu_bf16:
        act = fc * jax.nn.sigmoid(1.702 * fc)              # bf16 EUP (v6e / v7x)
    else:
        fc32 = fc.astype(f32)                              # v5e: f32 transcendental
        act = (fc32 * jax.nn.sigmoid(1.702 * fc32)).astype(bf16)
    mlp = jnp.dot(act, wpr_ref[0], preferred_element_type=f32) + bpr_ref[0]
    out_ref[...] = (x + mlp.reshape(Bb, L, W)).astype(out_ref.dtype)


# -------------------------------- wrapper ----------------------------------- #

def run_blocks(x, packed, n_head):
    B, L, W = x.shape                      # L already padded to a multiple of 8
    weights = packed['weights']
    layers = weights[0].shape[0]

    num_cores, vmem_limit, gelu_bf16 = _tpu_config()
    nt = _pick_batch_tiles(B, L, W, layers, n_head, num_cores, vmem_limit)
    bb = B // nt

    kernel = functools.partial(gpt_layers_kernel, n_head, gelu_bf16)

    x_spec = pl.BlockSpec((bb, L, W), lambda b, l: (b, 0, 0))
    w_specs = [pl.BlockSpec((1,) + tuple(w.shape[1:]), lambda b, l: (l, 0, 0))
               for w in weights]

    weight_bytes = layers * (12 * W * W * 2 + 18 * W * 4)
    flops = layers * (24 * B * L * W * W + 4 * B * L * L * W)
    transcendentals = layers * B * (n_head * L * L + 4 * L * W)
    bytes_accessed = nt * weight_bytes + 2 * B * L * W * 4

    return pl.pallas_call(
        kernel,
        out_shape=jax.ShapeDtypeStruct((B, L, W), x.dtype),
        grid_spec=pltpu.PrefetchScalarGridSpec(
            num_scalar_prefetch=0,
            grid=(nt, layers),
            in_specs=[x_spec] + w_specs,
            out_specs=x_spec,
        ),
        compiler_params=pltpu.CompilerParams(
            dimension_semantics=("parallel", "arbitrary"),
            vmem_limit_bytes=int(vmem_limit)),
        cost_estimate=pl.CostEstimate(flops=int(flops),
                                      transcendentals=int(transcendentals),
                                      bytes_accessed=int(bytes_accessed)),
    )(x, *weights)


@functools.partial(jax.jit, static_argnames=("heads",))
def gpt_forward(text, params, packed, heads):
    """text: (B, L) int32 tokens, L == context_length (discrete-text path)."""
    x = params['token_embedding'][text] + params['pos_embed'][None]   # (B, L, W)
    B, L, W = x.shape
    Lp = ((L + 7) // 8) * 8          # pad seq to a sublane multiple (relayout-free reshape)
    if Lp != L:
        x = jnp.pad(x, ((0, 0), (0, Lp - L), (0, 0)))
    x = run_blocks(x, packed, heads)
    x = x[:, :L]
    # final LN + argmax-row gather + projection stay in plain JAX (tiny op,
    # lane-narrow output; LN is per-position so gather-then-LN == LN-then-gather).
    idx = jnp.argmax(text, axis=-1)
    g = x[jnp.arange(B), idx]                                         # (B, W)
    g = _layernorm(g, params['ln_final_w'], params['ln_final_b'])
    return g @ params['projection']


# ------------------------- parameter init / packing ------------------------- #

def init_params(key, *, embed_dim, context_length, vocab_size, layers, width, heads):
    """Canonical (PyTorch-layout) parameters, all f32."""
    proj_std = width ** (-0.5) * (2 * layers) ** (-0.5)
    attn_std = width ** (-0.5)
    fc_std = (2 * width) ** (-0.5)
    f32 = jnp.float32
    keys = jax.random.split(key, 3 + 4 * layers)

    row = jnp.arange(context_length)[:, None]
    col = jnp.arange(context_length)[None, :]
    params = {
        'token_embedding': 0.02 * jax.random.normal(keys[0], (vocab_size, width), f32),
        'pos_embed': 0.01 * jax.random.normal(keys[1], (context_length, width), f32),
        'projection': attn_std * jax.random.normal(keys[2], (width, embed_dim), f32),
        'ln_final_w': jnp.ones((width,), f32),
        'ln_final_b': jnp.zeros((width,), f32),
        'attn_mask': jnp.where(col > row, -jnp.inf, 0.0).astype(f32),
    }

    blocks = []
    for li in range(layers):
        k0, k1, k2, k3 = keys[3 + 4 * li: 3 + 4 * (li + 1)]
        blocks.append({
            'ln1_w': jnp.ones((width,), f32), 'ln1_b': jnp.zeros((width,), f32),
            'in_proj_w': attn_std * jax.random.normal(k0, (3 * width, width), f32),
            'in_proj_b': jnp.zeros((3 * width,), f32),
            'out_proj_w': proj_std * jax.random.normal(k1, (width, width), f32),
            'out_proj_b': jnp.zeros((width,), f32),
            'ln2_w': jnp.ones((width,), f32), 'ln2_b': jnp.zeros((width,), f32),
            'fc_w': fc_std * jax.random.normal(k2, (4 * width, width), f32),
            'fc_b': jnp.zeros((4 * width,), f32),
            'proj_w': proj_std * jax.random.normal(k3, (width, 4 * width), f32),
            'proj_b': jnp.zeros((width,), f32),
        })
    params['blocks'] = blocks
    return params


def pack_params(params, heads):
    """Stack per-layer weights, pre-transpose, fold the q scale, cast to bf16."""
    blocks = params['blocks']
    W = params['pos_embed'].shape[-1]
    Dh = W // heads
    scale = 1.0 / math.sqrt(Dh)
    f32, bf16 = jnp.float32, jnp.bfloat16

    def stack(fn, dtype):
        return jnp.stack([fn(b).astype(dtype) for b in blocks], axis=0)

    def qkv_w(b):
        w = b['in_proj_w'].T                           # (W, 3W): y = x @ w
        return w.at[:, :W].multiply(scale)             # fold 1/sqrt(Dh) into Q

    def qkv_b(b):
        bias = b['in_proj_b'].at[:W].multiply(scale)
        return bias[None, :]                           # (1, 3W)

    weights = (
        stack(lambda b: b['ln1_w'][None, :], f32),     # (layers, 1, W)
        stack(lambda b: b['ln1_b'][None, :], f32),
        stack(qkv_w, bf16),                            # (layers, W, 3W)
        stack(qkv_b, f32),                             # (layers, 1, 3W)
        stack(lambda b: b['out_proj_w'].T, bf16),      # (layers, W, W)
        stack(lambda b: b['out_proj_b'][None, :], f32),
        stack(lambda b: b['ln2_w'][None, :], f32),
        stack(lambda b: b['ln2_b'][None, :], f32),
        stack(lambda b: b['fc_w'].T, bf16),            # (layers, W, 4W)
        stack(lambda b: b['fc_b'][None, :], f32),
        stack(lambda b: b['proj_w'].T, bf16),          # (layers, 4W, W)
        stack(lambda b: b['proj_b'][None, :], f32),
    )
    return {'weights': weights}


# ---------------------------- pure-JAX reference ----------------------------- #

def _ref_forward(text, params, heads):
    def ln(x, w, b):
        mu = jnp.mean(x, axis=-1, keepdims=True)
        var = jnp.mean((x - mu) ** 2, axis=-1, keepdims=True)
        return (x - mu) * jax.lax.rsqrt(var + 1e-5) * w + b

    x = params['token_embedding'][text] + params['pos_embed'][None]
    B, L, W = x.shape
    Dh = W // heads
    mask = params['attn_mask']
    for blk in params['blocks']:
        h = ln(x, blk['ln1_w'], blk['ln1_b'])
        qkv = h @ blk['in_proj_w'].T + blk['in_proj_b']
        q, k, v = qkv[..., :W], qkv[..., W:2 * W], qkv[..., 2 * W:]
        q = q.reshape(B, L, heads, Dh).transpose(0, 2, 1, 3) / math.sqrt(Dh)
        k = k.reshape(B, L, heads, Dh).transpose(0, 2, 1, 3)
        v = v.reshape(B, L, heads, Dh).transpose(0, 2, 1, 3)
        sc = jnp.einsum('bhld,bhmd->bhlm', q, k) + mask
        p = jax.nn.softmax(sc, axis=-1)
        o = jnp.einsum('bhlm,bhmd->bhld', p, v).transpose(0, 2, 1, 3).reshape(B, L, W)
        x = x + (o @ blk['out_proj_w'].T + blk['out_proj_b'])
        h = ln(x, blk['ln2_w'], blk['ln2_b'])
        fc = h @ blk['fc_w'].T + blk['fc_b']
        fc = fc * jax.nn.sigmoid(1.702 * fc)
        x = x + (fc @ blk['proj_w'].T + blk['proj_b'])
    x = ln(x, params['ln_final_w'], params['ln_final_b'])
    idx = jnp.argmax(text, axis=-1)
    return x[jnp.arange(B), idx] @ params['projection']


# ----------------------------------- main ------------------------------------ #

if __name__ == "__main__":
    # small but representative GPT config
    embed_dim = 16
    context_length = 8
    vocab_size = 64
    layers = 2
    width = 32
    heads = 4
    batch = 2

    key = jax.random.PRNGKey(0)
    pkey, tkey = jax.random.split(key)
    params = init_params(pkey, embed_dim=embed_dim, context_length=context_length,
                         vocab_size=vocab_size, layers=layers, width=width, heads=heads)
    packed = pack_params(params, heads)

    text = jax.random.randint(tkey, (batch, context_length), 0, vocab_size, jnp.int32)

    out = gpt_forward(text, params, packed, heads=heads)
    out = jax.block_until_ready(out)
    assert out.shape == (batch, embed_dim)

    ref = jax.block_until_ready(_ref_forward(text, params, heads))
    # bf16 MXU operands / bf16 intermediates (f32 accumulation) + approx
    # reciprocal -> slightly looser tolerance than pure f32.
    assert jnp.allclose(out, ref, rtol=5e-2, atol=5e-2), \
        f"mismatch: max abs err {jnp.max(jnp.abs(out - ref))}"

    print("KERNEL_OK")
</pallas_src>

<mosaic_0001>
module attributes {stable_mosaic.version = 11 : i64} {
  func.func @gpt_layers_kernel(%arg0: i32, %arg1: i32, %arg2: memref<2x8x32xf32, #tpu.memory_space<vmem>>, %arg3: memref<1x1x32xf32, #tpu.memory_space<vmem>>, %arg4: memref<1x1x32xf32, #tpu.memory_space<vmem>>, %arg5: memref<1x32x96xbf16, #tpu.memory_space<vmem>>, %arg6: memref<1x1x96xf32, #tpu.memory_space<vmem>>, %arg7: memref<1x32x32xbf16, #tpu.memory_space<vmem>>, %arg8: memref<1x1x32xf32, #tpu.memory_space<vmem>>, %arg9: memref<1x1x32xf32, #tpu.memory_space<vmem>>, %arg10: memref<1x1x32xf32, #tpu.memory_space<vmem>>, %arg11: memref<1x32x128xbf16, #tpu.memory_space<vmem>>, %arg12: memref<1x1x128xf32, #tpu.memory_space<vmem>>, %arg13: memref<1x128x32xbf16, #tpu.memory_space<vmem>>, %arg14: memref<1x1x32xf32, #tpu.memory_space<vmem>>, %arg15: memref<2x8x32xf32, #tpu.memory_space<vmem>>) attributes {dimension_semantics = [#tpu.dimension_semantics<parallel>, #tpu.dimension_semantics<arbitrary>], iteration_bounds = array<i64: 1, 2>, scalar_prefetch = 0 : i64, scratch_operands = 0 : i64, tpu.core_type = #tpu.core_type<tc>, window_params = [{transform_indices = @transform_0, window_bounds = array<i64: 2, 8, 32>}, {transform_indices = @transform_1, window_bounds = array<i64: 1, 1, 32>}, {transform_indices = @transform_2, window_bounds = array<i64: 1, 1, 32>}, {transform_indices = @transform_3, window_bounds = array<i64: 1, 32, 96>}, {transform_indices = @transform_4, window_bounds = array<i64: 1, 1, 96>}, {transform_indices = @transform_5, window_bounds = array<i64: 1, 32, 32>}, {transform_indices = @transform_6, window_bounds = array<i64: 1, 1, 32>}, {transform_indices = @transform_7, window_bounds = array<i64: 1, 1, 32>}, {transform_indices = @transform_8, window_bounds = array<i64: 1, 1, 32>}, {transform_indices = @transform_9, window_bounds = array<i64: 1, 32, 128>}, {transform_indices = @transform_10, window_bounds = array<i64: 1, 1, 128>}, {transform_indices = @transform_11, window_bounds = array<i64: 1, 128, 32>}, {transform_indices = @transform_12, window_bounds = array<i64: 1, 1, 32>}, {transform_indices = @transform_13, window_bounds = array<i64: 2, 8, 32>}]} {
    %c0_i32 = arith.constant 0 : i32
    %0 = arith.cmpi eq, %arg1, %c0_i32 : i32
    %1 = arith.extui %0 : i1 to i32
    %c0_i32_0 = arith.constant 0 : i32
    %2 = arith.cmpi ne, %1, %c0_i32_0 : i32
    scf.if %2 {
      %c0_62 = arith.constant 0 : index
      %c0_63 = arith.constant 0 : index
      %c0_64 = arith.constant 0 : index
      %153 = vector.load %arg2[%c0_62, %c0_63, %c0_64] : memref<2x8x32xf32, #tpu.memory_space<vmem>>, vector<2x8x32xf32>
      %c0_65 = arith.constant 0 : index
      %c0_66 = arith.constant 0 : index
      %c0_67 = arith.constant 0 : index
      %154 = vector.load %arg15[%c0_65, %c0_66, %c0_67] : memref<2x8x32xf32, #tpu.memory_space<vmem>>, vector<2x8x32xf32>
      tpu.vector_store %arg15[%c0_65, %c0_66, %c0_67], %153 {strides = array<i32>} : memref<2x8x32xf32, #tpu.memory_space<vmem>>, vector<2x8x32xf32>,
    } else {
    }
    %c0 = arith.constant 0 : index
    %c0_1 = arith.constant 0 : index
    %c0_2 = arith.constant 0 : index
    %3 = vector.load %arg15[%c0, %c0_1, %c0_2] : memref<2x8x32xf32, #tpu.memory_space<vmem>>, vector<2x8x32xf32>
    %4 = tpu.iota {dimensions = array<i32: 0>} : vector<8x8xi32>
    %5 = tpu.iota {dimensions = array<i32: 1>} : vector<8x8xi32>
    %6 = arith.cmpi sle, %5, %4 : vector<8x8xi32>
    %c0_3 = arith.constant 0 : index
    %c0_4 = arith.constant 0 : index
    %c0_5 = arith.constant 0 : index
    %7 = vector.load %arg3[%c0_3, %c0_4, %c0_5] : memref<1x1x32xf32, #tpu.memory_space<vmem>>, vector<1x1x32xf32>
    %8 = vector.shape_cast %7 : vector<1x1x32xf32> to vector<1x32xf32>
    %c0_6 = arith.constant 0 : index
    %c0_7 = arith.constant 0 : index
    %c0_8 = arith.constant 0 : index
    %9 = vector.load %arg4[%c0_6, %c0_7, %c0_8] : memref<1x1x32xf32, #tpu.memory_space<vmem>>, vector<1x1x32xf32>
    %10 = vector.shape_cast %9 : vector<1x1x32xf32> to vector<1x32xf32>
    %cst = arith.constant dense<0.000000e+00> : vector<2x8xf32>
    %11 = vector.multi_reduction <add>, %3, %cst [2] : vector<2x8x32xf32> to vector<2x8xf32>
    %12 = vector.shape_cast %11 : vector<2x8xf32> to vector<2x8x1xf32>
    %cst_9 = arith.constant 3.200000e+01 : f32
    %13 = vector.broadcast %cst_9 : f32 to vector<2x8x1xf32>
    %14 = arith.divf %12, %13 : vector<2x8x1xf32>
    %15 = vector.broadcast %14 : vector<2x8x1xf32> to vector<2x8x32xf32>
    %16 = arith.subf %3, %15 : vector<2x8x32xf32>
    %17 = arith.mulf %16, %16 : vector<2x8x32xf32>
    %cst_10 = arith.constant dense<0.000000e+00> : vector<2x8xf32>
    %18 = vector.multi_reduction <add>, %17, %cst_10 [2] : vector<2x8x32xf32> to vector<2x8xf32>
    %19 = vector.shape_cast %18 : vector<2x8xf32> to vector<2x8x1xf32>
    %cst_11 = arith.constant 3.200000e+01 : f32
    %20 = vector.broadcast %cst_11 : f32 to vector<2x8x1xf32>
    %21 = arith.divf %19, %20 : vector<2x8x1xf32>
    %22 = vector.broadcast %14 : vector<2x8x1xf32> to vector<2x8x32xf32>
    %23 = arith.subf %3, %22 : vector<2x8x32xf32>
    %cst_12 = arith.constant 9.99999974E-6 : f32
    %24 = vector.broadcast %cst_12 : f32 to vector<2x8x1xf32>
    %25 = arith.addf %21, %24 : vector<2x8x1xf32>
    %26 = math.rsqrt %25 : vector<2x8x1xf32>
    %27 = vector.broadcast %26 : vector<2x8x1xf32> to vector<2x8x32xf32>
    %28 = arith.mulf %23, %27 : vector<2x8x32xf32>
    %29 = vector.shape_cast %8 : vector<1x32xf32> to vector<1x1x32xf32>
    %30 = vector.broadcast %29 : vector<1x1x32xf32> to vector<2x8x32xf32>
    %31 = arith.mulf %28, %30 : vector<2x8x32xf32>
    %32 = vector.shape_cast %10 : vector<1x32xf32> to vector<1x1x32xf32>
    %33 = vector.broadcast %32 : vector<1x1x32xf32> to vector<2x8x32xf32>
    %34 = arith.addf %31, %33 : vector<2x8x32xf32>
    %35 = vector.shape_cast %34 : vector<2x8x32xf32> to vector<16x32xf32>
    %36 = arith.truncf %35 : vector<16x32xf32> to vector<16x32xbf16>
    %c0_13 = arith.constant 0 : index
    %c0_14 = arith.constant 0 : index
    %c0_15 = arith.constant 0 : index
    %37 = vector.load %arg5[%c0_13, %c0_14, %c0_15] : memref<1x32x96xbf16, #tpu.memory_space<vmem>>, vector<1x32x96xbf16>
    %38 = vector.shape_cast %37 : vector<1x32x96xbf16> to vector<32x96xbf16>
    %cst_16 = arith.constant dense<0.000000e+00> : vector<16x96xf32>
    %39 = tpu.matmul %36, %38, %cst_16 {dimension_numbers = #tpu.dot_dimension_numbers<[1], [0], [0], [1], [0, 0, 1, 1], [], []>} : vector<16x32xbf16>, vector<32x96xbf16>, vector<16x96xf32> -> vector<16x96xf32>
    %c0_17 = arith.constant 0 : index
    %c0_18 = arith.constant 0 : index
    %c0_19 = arith.constant 0 : index
    %40 = vector.load %arg6[%c0_17, %c0_18, %c0_19] : memref<1x1x96xf32, #tpu.memory_space<vmem>>, vector<1x1x96xf32>
    %41 = vector.shape_cast %40 : vector<1x1x96xf32> to vector<1x96xf32>
    %42 = vector.broadcast %41 : vector<1x96xf32> to vector<16x96xf32>
    %43 = arith.addf %39, %42 : vector<16x96xf32>
    %44 = arith.truncf %43 : vector<16x96xf32> to vector<16x96xbf16>
    %45 = vector.shape_cast %44 : vector<16x96xbf16> to vector<2x8x96xbf16>
    %46 = vector.extract_strided_slice %45 {offsets = [0, 0, 0], sizes = [2, 8, 32], strides = [1, 1, 1]} : vector<2x8x96xbf16> to vector<2x8x32xbf16>
    %47 = vector.extract_strided_slice %45 {offsets = [0, 0, 32], sizes = [2, 8, 32], strides = [1, 1, 1]} : vector<2x8x96xbf16> to vector<2x8x32xbf16>
    %48 = vector.extract_strided_slice %45 {offsets = [0, 0, 64], sizes = [2, 8, 32], strides = [1, 1, 1]} : vector<2x8x96xbf16> to vector<2x8x32xbf16>
    %49 = vector.extract_strided_slice %46 {offsets = [0, 0, 0], sizes = [2, 8, 8], strides = [1, 1, 1]} : vector<2x8x32xbf16> to vector<2x8x8xbf16>
    %50 = vector.extract_strided_slice %46 {offsets = [0, 0, 8], sizes = [2, 8, 8], strides = [1, 1, 1]} : vector<2x8x32xbf16> to vector<2x8x8xbf16>
    %51 = vector.extract_strided_slice %46 {offsets = [0, 0, 16], sizes = [2, 8, 8], strides = [1, 1, 1]} : vector<2x8x32xbf16> to vector<2x8x8xbf16>
    %52 = vector.extract_strided_slice %46 {offsets = [0, 0, 24], sizes = [2, 8, 8], strides = [1, 1, 1]} : vector<2x8x32xbf16> to vector<2x8x8xbf16>
    %53 = tpu.concatenate %49, %50, %51, %52 in 0 : vector<2x8x8xbf16>, vector<2x8x8xbf16>, vector<2x8x8xbf16>, vector<2x8x8xbf16> -> vector<8x8x8xbf16>
    %54 = vector.extract_strided_slice %47 {offsets = [0, 0, 0], sizes = [2, 8, 8], strides = [1, 1, 1]} : vector<2x8x32xbf16> to vector<2x8x8xbf16>
    %55 = vector.extract_strided_slice %47 {offsets = [0, 0, 8], sizes = [2, 8, 8], strides = [1, 1, 1]} : vector<2x8x32xbf16> to vector<2x8x8xbf16>
    %56 = vector.extract_strided_slice %47 {offsets = [0, 0, 16], sizes = [2, 8, 8], strides = [1, 1, 1]} : vector<2x8x32xbf16> to vector<2x8x8xbf16>
    %57 = vector.extract_strided_slice %47 {offsets = [0, 0, 24], sizes = [2, 8, 8], strides = [1, 1, 1]} : vector<2x8x32xbf16> to vector<2x8x8xbf16>
    %58 = tpu.concatenate %54, %55, %56, %57 in 0 : vector<2x8x8xbf16>, vector<2x8x8xbf16>, vector<2x8x8xbf16>, vector<2x8x8xbf16> -> vector<8x8x8xbf16>
    %59 = vector.extract_strided_slice %48 {offsets = [0, 0, 0], sizes = [2, 8, 8], strides = [1, 1, 1]} : vector<2x8x32xbf16> to vector<2x8x8xbf16>
    %60 = vector.extract_strided_slice %48 {offsets = [0, 0, 8], sizes = [2, 8, 8], strides = [1, 1, 1]} : vector<2x8x32xbf16> to vector<2x8x8xbf16>
    %61 = vector.extract_strided_slice %48 {offsets = [0, 0, 16], sizes = [2, 8, 8], strides = [1, 1, 1]} : vector<2x8x32xbf16> to vector<2x8x8xbf16>
    %62 = vector.extract_strided_slice %48 {offsets = [0, 0, 24], sizes = [2, 8, 8], strides = [1, 1, 1]} : vector<2x8x32xbf16> to vector<2x8x8xbf16>
    %63 = tpu.concatenate %59, %60, %61, %62 in 0 : vector<2x8x8xbf16>, vector<2x8x8xbf16>, vector<2x8x8xbf16>, vector<2x8x8xbf16> -> vector<8x8x8xbf16>
    "tpu.trace_start"() <{level = 10 : i32, message = "bld,bmd->blm"}> : () -> ()
    %cst_20 = arith.constant dense<0.000000e+00> : vector<8x8x8xf32>
    %64 = tpu.matmul %53, %58, %cst_20 {dimension_numbers = #tpu.dot_dimension_numbers<[2], [2], [1], [1], [0, 0, 0, 1, 1, 1], [0], [0]>} : vector<8x8x8xbf16>, vector<8x8x8xbf16>, vector<8x8x8xf32> -> vector<8x8x8xf32>
    %cst_21 = arith.constant -1.000000e+30 : f32
    "tpu.trace_stop"() : () -> ()
    %65 = vector.shape_cast %6 : vector<8x8xi1> to vector<1x8x8xi1>
    %66 = vector.broadcast %65 : vector<1x8x8xi1> to vector<8x8x8xi1>
    %67 = vector.broadcast %cst_21 : f32 to vector<8x8x8xf32>
    %68 = arith.select %66, %64, %67 : vector<8x8x8xi1>, vector<8x8x8xf32>
    %cst_22 = arith.constant dense<0xFF800000> : vector<8x8xf32>
    %69 = vector.multi_reduction <maximumf>, %68, %cst_22 [2] : vector<8x8x8xf32> to vector<8x8xf32>
    %70 = vector.shape_cast %69 : vector<8x8xf32> to vector<8x8x1xf32>
    %71 = vector.broadcast %70 : vector<8x8x1xf32> to vector<8x8x8xf32>
    %72 = arith.subf %68, %71 : vector<8x8x8xf32>
    %73 = math.exp %72 : vector<8x8x8xf32>
    %cst_23 = arith.constant dense<0.000000e+00> : vector<8x8xf32>
    %74 = vector.multi_reduction <add>, %73, %cst_23 [2] : vector<8x8x8xf32> to vector<8x8xf32>
    %75 = vector.shape_cast %74 : vector<8x8xf32> to vector<8x8x1xf32>
    %76 = tpu.reciprocal %75 {approx = true} : vector<8x8x1xf32> -> vector<8x8x1xf32>
    %77 = vector.broadcast %76 : vector<8x8x1xf32> to vector<8x8x8xf32>
    %78 = arith.mulf %73, %77 : vector<8x8x8xf32>
    %79 = arith.truncf %78 : vector<8x8x8xf32> to vector<8x8x8xbf16>
    "tpu.trace_start"() <{level = 10 : i32, message = "blm,bmd->bld"}> : () -> ()
    %cst_24 = arith.constant dense<0.000000e+00> : vector<8x8x8xf32>
    %80 = tpu.matmul %79, %63, %cst_24 {dimension_numbers = #tpu.dot_dimension_numbers<[2], [1], [1], [2], [0, 0, 0, 1, 1, 2], [0], [0]>} : vector<8x8x8xbf16>, vector<8x8x8xbf16>, vector<8x8x8xf32> -> vector<8x8x8xf32>
    "tpu.trace_stop"() : () -> ()
    %81 = arith.truncf %80 : vector<8x8x8xf32> to vector<8x8x8xbf16>
    %82 = vector.extract_strided_slice %81 {offsets = [0, 0, 0], sizes = [2, 8, 8], strides = [1, 1, 1]} : vector<8x8x8xbf16> to vector<2x8x8xbf16>
    %83 = vector.extract_strided_slice %81 {offsets = [2, 0, 0], sizes = [2, 8, 8], strides = [1, 1, 1]} : vector<8x8x8xbf16> to vector<2x8x8xbf16>
    %84 = vector.extract_strided_slice %81 {offsets = [4, 0, 0], sizes = [2, 8, 8], strides = [1, 1, 1]} : vector<8x8x8xbf16> to vector<2x8x8xbf16>
    %85 = vector.extract_strided_slice %81 {offsets = [6, 0, 0], sizes = [2, 8, 8], strides = [1, 1, 1]} : vector<8x8x8xbf16> to vector<2x8x8xbf16>
    %86 = tpu.concatenate %82, %83, %84, %85 in 2 : vector<2x8x8xbf16>, vector<2x8x8xbf16>, vector<2x8x8xbf16>, vector<2x8x8xbf16> -> vector<2x8x32xbf16>
    %87 = vector.shape_cast %86 : vector<2x8x32xbf16> to vector<16x32xbf16>
    %c0_25 = arith.constant 0 : index
    %c0_26 = arith.constant 0 : index
    %c0_27 = arith.constant 0 : index
    %88 = vector.load %arg7[%c0_25, %c0_26, %c0_27] : memref<1x32x32xbf16, #tpu.memory_space<vmem>>, vector<1x32x32xbf16>
    %89 = vector.shape_cast %88 : vector<1x32x32xbf16> to vector<32x32xbf16>
    %cst_28 = arith.constant dense<0.000000e+00> : vector<16x32xf32>
    %90 = tpu.matmul %87, %89, %cst_28 {dimension_numbers = #tpu.dot_dimension_numbers<[1], [0], [0], [1], [0, 0, 1, 1], [], []>} : vector<16x32xbf16>, vector<32x32xbf16>, vector<16x32xf32> -> vector<16x32xf32>
    %c0_29 = arith.constant 0 : index
    %c0_30 = arith.constant 0 : index
    %c0_31 = arith.constant 0 : index
    %91 = vector.load %arg8[%c0_29, %c0_30, %c0_31] : memref<1x1x32xf32, #tpu.memory_space<vmem>>, vector<1x1x32xf32>
    %92 = vector.shape_cast %91 : vector<1x1x32xf32> to vector<1x32xf32>
    %93 = vector.broadcast %92 : vector<1x32xf32> to vector<16x32xf32>
    %94 = arith.addf %90, %93 : vector<16x32xf32>
    %95 = vector.shape_cast %94 : vector<16x32xf32> to vector<2x8x32xf32>
    %96 = arith.addf %3, %95 : vector<2x8x32xf32>
    %c0_32 = arith.constant 0 : index
    %c0_33 = arith.constant 0 : index
    %c0_34 = arith.constant 0 : index
    %97 = vector.load %arg9[%c0_32, %c0_33, %c0_34] : memref<1x1x32xf32, #tpu.memory_space<vmem>>, vector<1x1x32xf32>
    %98 = vector.shape_cast %97 : vector<1x1x32xf32> to vector<1x32xf32>
    %c0_35 = arith.constant 0 : index
    %c0_36 = arith.constant 0 : index
    %c0_37 = arith.constant 0 : index
    %99 = vector.load %arg10[%c0_35, %c0_36, %c0_37] : memref<1x1x32xf32, #tpu.memory_space<vmem>>, vector<1x1x32xf32>
    %100 = vector.shape_cast %99 : vector<1x1x32xf32> to vector<1x32xf32>
    %cst_38 = arith.constant dense<0.000000e+00> : vector<2x8xf32>
    %101 = vector.multi_reduction <add>, %96, %cst_38 [2] : vector<2x8x32xf32> to vector<2x8xf32>
    %102 = vector.shape_cast %101 : vector<2x8xf32> to vector<2x8x1xf32>
    %cst_39 = arith.constant 3.200000e+01 : f32
    %103 = vector.broadcast %cst_39 : f32 to vector<2x8x1xf32>
    %104 = arith.divf %102, %103 : vector<2x8x1xf32>
    %105 = vector.broadcast %104 : vector<2x8x1xf32> to vector<2x8x32xf32>
    %106 = arith.subf %96, %105 : vector<2x8x32xf32>
    %107 = arith.mulf %106, %106 : vector<2x8x32xf32>
    %cst_40 = arith.constant dense<0.000000e+00> : vector<2x8xf32>
    %108 = vector.multi_reduction <add>, %107, %cst_40 [2] : vector<2x8x32xf32> to vector<2x8xf32>
    %109 = vector.shape_cast %108 : vector<2x8xf32> to vector<2x8x1xf32>
    %cst_41 = arith.constant 3.200000e+01 : f32
    %110 = vector.broadcast %cst_41 : f32 to vector<2x8x1xf32>
    %111 = arith.divf %109, %110 : vector<2x8x1xf32>
    %112 = vector.broadcast %104 : vector<2x8x1xf32> to vector<2x8x32xf32>
    %113 = arith.subf %96, %112 : vector<2x8x32xf32>
    %cst_42 = arith.constant 9.99999974E-6 : f32
    %114 = vector.broadcast %cst_42 : f32 to vector<2x8x1xf32>
    %115 = arith.addf %111, %114 : vector<2x8x1xf32>
    %116 = math.rsqrt %115 : vector<2x8x1xf32>
    %117 = vector.broadcast %116 : vector<2x8x1xf32> to vector<2x8x32xf32>
    %118 = arith.mulf %113, %117 : vector<2x8x32xf32>
    %119 = vector.shape_cast %98 : vector<1x32xf32> to vector<1x1x32xf32>
    %120 = vector.broadcast %119 : vector<1x1x32xf32> to vector<2x8x32xf32>
    %121 = arith.mulf %118, %120 : vector<2x8x32xf32>
    %122 = vector.shape_cast %100 : vector<1x32xf32> to vector<1x1x32xf32>
    %123 = vector.broadcast %122 : vector<1x1x32xf32> to vector<2x8x32xf32>
    %124 = arith.addf %121, %123 : vector<2x8x32xf32>
    %125 = vector.shape_cast %124 : vector<2x8x32xf32> to vector<16x32xf32>
    %126 = arith.truncf %125 : vector<16x32xf32> to vector<16x32xbf16>
    %c0_43 = arith.constant 0 : index
    %c0_44 = arith.constant 0 : index
    %c0_45 = arith.constant 0 : index
    %127 = vector.load %arg11[%c0_43, %c0_44, %c0_45] : memref<1x32x128xbf16, #tpu.memory_space<vmem>>, vector<1x32x128xbf16>
    %128 = vector.shape_cast %127 : vector<1x32x128xbf16> to vector<32x128xbf16>
    %cst_46 = arith.constant dense<0.000000e+00> : vector<16x128xf32>
    %129 = tpu.matmul %126, %128, %cst_46 {dimension_numbers = #tpu.dot_dimension_numbers<[1], [0], [0], [1], [0, 0, 1, 1], [], []>} : vector<16x32xbf16>, vector<32x128xbf16>, vector<16x128xf32> -> vector<16x128xf32>
    %c0_47 = arith.constant 0 : index
    %c0_48 = arith.constant 0 : index
    %c0_49 = arith.constant 0 : index
    %130 = vector.load %arg12[%c0_47, %c0_48, %c0_49] : memref<1x1x128xf32, #tpu.memory_space<vmem>>, vector<1x1x128xf32>
    %131 = vector.shape_cast %130 : vector<1x1x128xf32> to vector<1x128xf32>
    %132 = vector.broadcast %131 : vector<1x128xf32> to vector<16x128xf32>
    %133 = arith.addf %129, %132 : vector<16x128xf32>
    %134 = arith.truncf %133 : vector<16x128xf32> to vector<16x128xbf16>
    %cst_50 = arith.constant 1.703130e+00 : bf16
    %135 = vector.broadcast %cst_50 : bf16 to vector<16x128xbf16>
    %136 = arith.mulf %135, %134 : vector<16x128xbf16>
    %137 = arith.negf %136 : vector<16x128xbf16>
    %138 = math.exp %137 : vector<16x128xbf16>
    %cst_51 = arith.constant 1.000000e+00 : bf16
    %139 = vector.broadcast %cst_51 : bf16 to vector<16x128xbf16>
    %140 = arith.addf %139, %138 : vector<16x128xbf16>
    %141 = arith.divf %139, %140 : vector<16x128xbf16>
    %142 = arith.mulf %134, %141 : vector<16x128xbf16>
    %c0_52 = arith.constant 0 : index
    %c0_53 = arith.constant 0 : index
    %c0_54 = arith.constant 0 : index
    %143 = vector.load %arg13[%c0_52, %c0_53, %c0_54] : memref<1x128x32xbf16, #tpu.memory_space<vmem>>, vector<1x128x32xbf16>
    %144 = vector.shape_cast %143 : vector<1x128x32xbf16> to vector<128x32xbf16>
    %cst_55 = arith.constant dense<0.000000e+00> : vector<16x32xf32>
    %145 = tpu.matmul %142, %144, %cst_55 {dimension_numbers = #tpu.dot_dimension_numbers<[1], [0], [0], [1], [0, 0, 1, 1], [], []>} : vector<16x128xbf16>, vector<128x32xbf16>, vector<16x32xf32> -> vector<16x32xf32>
    %c0_56 = arith.constant 0 : index
    %c0_57 = arith.constant 0 : index
    %c0_58 = arith.constant 0 : index
    %146 = vector.load %arg14[%c0_56, %c0_57, %c0_58] : memref<1x1x32xf32, #tpu.memory_space<vmem>>, vector<1x1x32xf32>
    %147 = vector.shape_cast %146 : vector<1x1x32xf32> to vector<1x32xf32>
    %148 = vector.broadcast %147 : vector<1x32xf32> to vector<16x32xf32>
    %149 = arith.addf %145, %148 : vector<16x32xf32>
    %150 = vector.shape_cast %149 : vector<16x32xf32> to vector<2x8x32xf32>
    %151 = arith.addf %96, %150 : vector<2x8x32xf32>
    %c0_59 = arith.constant 0 : index
    %c0_60 = arith.constant 0 : index
    %c0_61 = arith.constant 0 : index
    %152 = vector.load %arg15[%c0_59, %c0_60, %c0_61] : memref<2x8x32xf32, #tpu.memory_space<vmem>>, vector<2x8x32xf32>
    tpu.vector_store %arg15[%c0_59, %c0_60, %c0_61], %151 {strides = array<i32>} : memref<2x8x32xf32, #tpu.memory_space<vmem>>, vector<2x8x32xf32>,
    return
  }
  func.func @transform_0(%arg0: i32, %arg1: i32) -> (i32, i32, i32) {
    %c0_i32 = arith.constant 0 : i32
    %c0_i32_0 = arith.constant 0 : i32
    %c0_i32_1 = arith.constant 0 : i32
    return %arg0, %c0_i32, %c0_i32_0 : i32, i32, i32
  }
  func.func @transform_1(%arg0: i32, %arg1: i32) -> (i32, i32, i32) {
    %c0_i32 = arith.constant 0 : i32
    %c0_i32_0 = arith.constant 0 : i32
    %c0_i32_1 = arith.constant 0 : i32
    return %arg1, %c0_i32, %c0_i32_0 : i32, i32, i32
  }
  func.func @transform_2(%arg0: i32, %arg1: i32) -> (i32, i32, i32) {
    %c0_i32 = arith.constant 0 : i32
    %c0_i32_0 = arith.constant 0 : i32
    %c0_i32_1 = arith.constant 0 : i32
    return %arg1, %c0_i32, %c0_i32_0 : i32, i32, i32
  }
  func.func @transform_3(%arg0: i32, %arg1: i32) -> (i32, i32, i32) {
    %c0_i32 = arith.constant 0 : i32
    %c0_i32_0 = arith.constant 0 : i32
    %c0_i32_1 = arith.constant 0 : i32
    return %arg1, %c0_i32, %c0_i32_0 : i32, i32, i32
  }
  func.func @transform_4(%arg0: i32, %arg1: i32) -> (i32, i32, i32) {
    %c0_i32 = arith.constant 0 : i32
    %c0_i32_0 = arith.constant 0 : i32
    %c0_i32_1 = arith.constant 0 : i32
    return %arg1, %c0_i32, %c0_i32_0 : i32, i32, i32
  }
  func.func @transform_5(%arg0: i32, %arg1: i32) -> (i32, i32, i32) {
    %c0_i32 = arith.constant 0 : i32
    %c0_i32_0 = arith.constant 0 : i32
    %c0_i32_1 = arith.constant 0 : i32
    return %arg1, %c0_i32, %c0_i32_0 : i32, i32, i32
  }
  func.func @transform_6(%arg0: i32, %arg1: i32) -> (i32, i32, i32) {
    %c0_i32 = arith.constant 0 : i32
    %c0_i32_0 = arith.constant 0 : i32
    %c0_i32_1 = arith.constant 0 : i32
    return %arg1, %c0_i32, %c0_i32_0 : i32, i32, i32
  }
  func.func @transform_7(%arg0: i32, %arg1: i32) -> (i32, i32, i32) {
    %c0_i32 = arith.constant 0 : i32
    %c0_i32_0 = arith.constant 0 : i32
    %c0_i32_1 = arith.constant 0 : i32
    return %arg1, %c0_i32, %c0_i32_0 : i32, i32, i32
  }
  func.func @transform_8(%arg0: i32, %arg1: i32) -> (i32, i32, i32) {
    %c0_i32 = arith.constant 0 : i32
    %c0_i32_0 = arith.constant 0 : i32
    %c0_i32_1 = arith.constant 0 : i32
    return %arg1, %c0_i32, %c0_i32_0 : i32, i32, i32
  }
  func.func @transform_9(%arg0: i32, %arg1: i32) -> (i32, i32, i32) {
    %c0_i32 = arith.constant 0 : i32
    %c0_i32_0 = arith.constant 0 : i32
    %c0_i32_1 = arith.constant 0 : i32
    return %arg1, %c0_i32, %c0_i32_0 : i32, i32, i32
  }
  func.func @transform_10(%arg0: i32, %arg1: i32) -> (i32, i32, i32) {
    %c0_i32 = arith.constant 0 : i32
    %c0_i32_0 = arith.constant 0 : i32
    %c0_i32_1 = arith.constant 0 : i32
    return %arg1, %c0_i32, %c0_i32_0 : i32, i32, i32
  }
  func.func @transform_11(%arg0: i32, %arg1: i32) -> (i32, i32, i32) {
    %c0_i32 = arith.constant 0 : i32
    %c0_i32_0 = arith.constant 0 : i32
    %c0_i32_1 = arith.constant 0 : i32
    return %arg1, %c0_i32, %c0_i32_0 : i32, i32, i32
  }
  func.func @transform_12(%arg0: i32, %arg1: i32) -> (i32, i32, i32) {
    %c0_i32 = arith.constant 0 : i32
    %c0_i32_0 = arith.constant 0 : i32
    %c0_i32_1 = arith.constant 0 : i32
    return %arg1, %c0_i32, %c0_i32_0 : i32, i32, i32
  }
  func.func @transform_13(%arg0: i32, %arg1: i32) -> (i32, i32, i32) {
    %c0_i32 = arith.constant 0 : i32
    %c0_i32_0 = arith.constant 0 : i32
    %c0_i32_1 = arith.constant 0 : i32
    return %arg0, %c0_i32, %c0_i32_0 : i32, i32, i32
  }
}

</mosaic_0001>

<bundles_post_ra>
// kernel: gpt_forward.1
= control target key start
LH: loop header
LB: loop body
LE: loop exit
PB: predicated region body
PF: predicated region fallthrough
CT: control target
= control target key end

     0   :  { %s2063_s25 = smov 0   ;;  %s2065_s26 = smov 0   ;;  %s2385_s0 = inlined_call_operand.vmem [shape: f32[2,8,32], index: 0, kind: input, shape index: {}]   ;;  %s2386_s1 = inlined_call_operand.vmem [shape: f32[2,1,32], index: 1, kind: input, shape index: {}]   ;;  %s2387_s2 = inlined_call_operand.vmem [shape: f32[2,1,32], index: 2, kind: input, shape index: {}]   ;;  %s2388_s3 = inlined_call_operand.vmem [shape: bf16[2,32,96], index: 3, kind: input, shape index: {}]   ;;  %s2389_s4 = inlined_call_operand.vmem [shape: f32[2,1,96], index: 4, kind: input, shape index: {}]   ;;  %s2390_s5 = inlined_call_operand.vmem [shape: bf16[2,32,32], index: 5, kind: input, shape index: {}]   ;;  %s2391_s6 = inlined_call_operand.vmem [shape: f32[2,1,32], index: 6, kind: input, shape index: {}]   ;;  %s2392_s7 = inlined_call_operand.vmem [shape: f32[2,1,32], index: 7, kind: input, shape index: {}]   ;;  %s2393_s8 = inlined_call_operand.vmem [shape: f32[2,1,32], index: 8, kind: input, shape index: {}]   ;;  %s2394_s9 = inlined_call_operand.vmem [shape: bf16[2,32,128], index: 9, kind: input, shape index: {}]   ;;  %s2395_s10 = inlined_call_operand.vmem [shape: f32[2,1,128], index: 10, kind: input, shape index: {}]   ;;  %s2396_s11 = inlined_call_operand.vmem [shape: bf16[2,128,32], index: 11, kind: input, shape index: {}]   ;;  %s2397_s12 = inlined_call_operand.vmem [shape: f32[2,1,32], index: 12, kind: input, shape index: {}]   ;;  %s2398_s13 = inlined_call_operand.vmem [shape: f32[2,8,32], index: 13, kind: output, shape index: {}]  }
   0x1   :  { %2402 = sst [smem:[#allocation6_spill]] %s2387_s2  ;;  %s2067_s27 = smov 0  }
   0x2   :  { %2403 = sst [smem:[#allocation7_spill]] %s2388_s3 }
   0x3   :  { %2404 = sst [smem:[#allocation8_spill]] %s2390_s5 }
   0x4 LB: > { %2405 = sst [smem:[#allocation2_spill]] %s1977_s26  ;;  %s32_s28 = sadd.s32 1, %s1977_s26  ;;  %s1981_s27 = sphi %s2067_s27, %s23_s27   ;;  %s1977_s26 = sphi %s2065_s26, %s2422_s26   ;;  %s1973_s25 = sphi %s2063_s25, %s2421_s25  }
   0x5   : > { %2406 = sst [smem:[#allocation3_spill]] %s1981_s27  ;;  %p1756_p0 = scmp.ge.s32.totalorder %s1981_s27, 1 }
   0x6   : > { %p33_p1 = scmp.ge.s32.totalorder %s32_s28, 2  ;;  %p504_p2 = scmp.lt.s32.totalorder %s1981_s27, 3 }
   0x8   : > { %s2424_s28 = smov (%p33_p1, %s32_s28), 0  ;;  %p505_p3 = pnand %p1756_p0, %p504_p2 }
   0x9   : > { %2407 = sst [smem:[#allocation4_spill]] %s2424_s28 }
   0xa   : > { %508 = sbr.rel (%p505_p3) target bundleno = 2128 (0x850), region = 72 }
   0xf   : > { %p598_p4 = scmp.lt.s32.totalorder %s1973_s25, 1  ;;  %s2409_s3 = sld [smem:[#allocation7_spill]] }
  0x10   : > { %s2410_s5 = sld [smem:[#allocation8_spill]]  ;;  %p1765_p5 = scmp.ne.s32.totalorder %s1973_s25, 0 }
  0x11   : > { %s2081_s29 = scalar_select %p598_p4, %s1973_s25, 1 }
  0x13   : > { %s1845_s19 = sshll.u32 %s2081_s29, 4  ;;  %s622_s2 = scalar_lea.vmem %s2392_s7, %s2081_s29 }
  0x14   : > { %s625_s22 = scalar_lea.vmem %s2393_s8, %s2081_s29  ;;  %s641_s20 = scalar_lea.vmem %s2397_s12, %s2081_s29 }
  0x15   : > { %s2099_s30 = scalar_lea.vmem %s2409_s3, %s1845_s19  ;;  %s2121_s3 = scalar_lea.vmem %s2394_s9, %s1845_s19 }
  0x16   : > { %s2104_s26 = scalar_lea.vmem %s2410_s5, %s1845_s19  ;;  %s633_s5 = scalar_lea.vmem %s2395_s10, %s2081_s29 }
  0x17   : > { %2411 = sst [smem:[#allocation5_spill]] %s2104_s26  ;;  %s1848_s26 = sshll.u32 %s2081_s29, 6 }
  0x18   : > { %s2131_s16 = scalar_lea.vmem %s2396_s11, %s1848_s26  ;;  %653 = sbr.rel (%p1765_p5) target bundleno = 32 (0x20), region = 76 }
  0x1d   : > { %v654_v0 = vld [vmem:[%s2385_s0] sm:$0xff]  ;;  %vm656_vm0 = vcmask 261120   ;;  %v655_v1 = vld [vmem:[%s2385_s0 + $0x8] sm:$0xff] }
  0x1e   : > { %657 = vst.msk [vmem:[%s2398_s13] sm:$0xff] %vm656_vm0, %v654_v0 }
  0x1f   : > { %658 = vst.msk [vmem:[%s2398_s13 + $0x8] sm:$0xff] %vm656_vm0, %v655_v1 }
  0x20 PF: > { %vm668_vm1 = vcmask 261120   ;;  %v1983_v6 = vmov 32.0   ;;  %v1850_v23 = vld [vmem:[%s2099_s30 + $0x8] sm:$0xff]  ;;  %v1849_v25 = vld [vmem:[%s2099_s30] sm:$0xff]  ;;  %s2412_s23 = scalar_lea.vmem %s2386_s1, %s2081_s29  ;;  %s2413_s28 = sld [smem:[#allocation6_spill]]  ;;  %vm788_vm9 = vcmask 64512  }
  0x21   : > { %1905 = vrcp.f32 %v1983_v6  ;;  %760 = vmatpush.bf16.msra.mxu0 %v1850_v23  ;;  %v1897_v44 = vld [vmem:[%s2412_s23] ss:$0 sm:$0xff]  ;;  %s2415_s25 = scalar_lea.vmem %s2389_s4, %s2081_s29  ;;  %s1984_s15 = smov 104   ;;  %vm1080_vm10 = vcmask 1043456   ;;  %vm1288_vm12 = vcmask 130048   ;;  %vm1293_vm13 = vcmask 195584  }
  0x22   : > { %v1899_v54 = vld [vmem:[%s2415_s25] ss:$0 sm:$0xff]  ;;  %s1985_s18 = smov 120   ;;  %s1986_s17 = smov 112  }
  0x23   : > { %s1987_s30 = smov 96   ;;  %s1988_s21 = smov 64  }
  0x24   : > { %s1989_s23 = smov 8   ;;  %s1990_s19 = smov 24  }
  0x25   : > { %v2152_v2 = vld [vmem:[%s2398_s13] sm:$0xff]  ;;  %761 = vmatpush.bf16.msra.mxu0 %v1849_v25  ;;  %s2418_s24 = sld [smem:[#allocation5_spill]]  ;;  %s2419_s27 = scalar_lea.vmem %s2391_s6, %s2081_s29 }
  0x26   : > { %v669_v3 = vsel %vm668_vm1, %v2152_v2, 0.0  ;;  %v2159_v4 = vld [vmem:[%s2398_s13 + $0x8] sm:$0xff]  ;;  %s2414_s14 = scalar_lea.vmem %s2413_s28, %s2081_s29  ;;  %s1991_s28 = smov 16  }
  0x27   : > { %670 = vadd.xlane.f32.xlu0 %v669_v3  ;;  %v672_v5 = vsel %vm668_vm1, %v2159_v4, 0.0  ;;  %v1906_v7 = vpop.eup %1905  ;;  %v1898_v49 = vld [vmem:[%s2414_s14] ss:$0 sm:$0xff] }
  0x28   : > { %v676_v8 = vmul.f32 32.0, %v1906_v7  ;;  %vm680_vm2 = vweird.f32 %v1906_v7 }
  0x2a   : > { %v677_v9 = vsub.f32 1.0, %v676_v8 }
  0x2c   : > { %v678_v10 = vmul.f32 %v1906_v7, %v677_v9 }
  0x2e   : > { %v679_v11 = vadd.f32 %v1906_v7, %v678_v10 }
  0x2f   : > { %673 = vadd.xlane.f32.xlu0 %v672_v5 }
  0x30   : > { %v2163_v12 = vsel %vm680_vm2, %v1906_v7, %v679_v11 }
  0x9a   : > { %v671_v13 = vpop.xlane.xlu0 %670 }
  0x9b   : > { %v682_v14 = vmul.f32 %v2163_v12, %v671_v13 }
  0x9d   : > { %v684_v15 = vsub.f32 %v2152_v2, %v682_v14 }
  0x9f   : > { %v686_v16 = vmul.f32 %v684_v15, %v684_v15 }
  0xa1   : > { %v688_v17 = vsel %vm668_vm1, %v686_v16, 0.0 }
  0xa2   : > { %689 = vadd.xlane.f32.xlu1 %v688_v17  ;;  %v674_v18 = vpop.xlane.xlu0 %673 }
  0xa3   : > { %v683_v19 = vmul.f32 %v2163_v12, %v674_v18 }
  0xa5   : > { %v685_v20 = vsub.f32 %v2159_v4, %v683_v19 }
  0xa7   : > { %v687_v21 = vmul.f32 %v685_v20, %v685_v20 }
  0xa9   : > { %v691_v22 = vsel %vm668_vm1, %v687_v21, 0.0 }
  0xaa   : > { %692 = vadd.xlane.f32.xlu1 %v691_v22 }
 0x115   : > { %v690_v24 = vpop.xlane.xlu1 %689 }
 0x116   : > { %v694_v26 = vmul.f32 %v690_v24, %v2163_v12 }
 0x118   : > { %v696_v27 = vadd.f32 1e-05, %v694_v26 }
 0x11a   : > { %1907 = vrsqrt.f32 %v696_v27  ;;  %vm704_vm4 = vweird.f32 %v696_v27 }
 0x11d   : > { %v693_v28 = vpop.xlane.xlu1 %692 }
 0x11e   : > { %v695_v29 = vmul.f32 %v693_v28, %v2163_v12 }
 0x120   : > { %v1908_v30 = vpop.eup %1907  ;;  %v697_v31 = vadd.f32 1e-05, %v695_v29 }
 0x121   : > { %v699_v32 = vmul.f32 %v1908_v30, %v696_v27  ;;  %vm705_vm3 = vweird.f32 %v1908_v30 }
 0x122   : > { %1909 = vrsqrt.f32 %v697_v31  ;;  %vm706_vm5 = vmor %vm704_vm4, %vm705_vm3  ;;  %vm714_vm7 = vweird.f32 %v697_v31 }
 0x123   : > { %v700_v33 = vmul.f32 %v1908_v30, %v699_v32 }
 0x125   : > { %v701_v34 = vmul.f32 0.5, %v700_v33 }
 0x127   : > { %v702_v35 = vsub.f32 1.5, %v701_v34 }
 0x128   : > { %v1910_v36 = vpop.eup %1909 }
 0x129   : > { %v703_v37 = vmul.f32 %v1908_v30, %v702_v35  ;;  %v709_v38 = vmul.f32 %v1910_v36, %v697_v31  ;;  %vm715_vm6 = vweird.f32 %v1910_v36 }
 0x12a   : > { %vm716_vm8 = vmor %vm714_vm7, %vm715_vm6 }
 0x12b   : > { %v710_v39 = vmul.f32 %v1910_v36, %v709_v38  ;;  %v707_v40 = vsel %vm706_vm5, %v1908_v30, %v703_v37 }
 0x12c   : > { %v718_v43 = vmul.f32 %v707_v40, %v684_v15 }
 0x12d   : > { %v711_v41 = vmul.f32 0.5, %v710_v39 }
 0x12e   : > { %v723_v48 = vmul.f32 %v1897_v44, %v718_v43 }
 0x12f   : > { %v712_v42 = vsub.f32 1.5, %v711_v41 }
 0x130   : > { %v728_v51 = vadd.f32 %v1898_v49, %v723_v48 }
 0x131   : > { %v713_v45 = vmul.f32 %v1910_v36, %v712_v42  ;;  %v661_v42 = vlaneseq }
 0x133   : > { %v717_v46 = vsel %vm716_vm8, %v1910_v36, %v713_v45  ;;  %v662_v43 = vshrl.u32 %v661_v42, 7 }
 0x134   : > { %v719_v47 = vmul.f32 %v717_v46, %v685_v20 }
 0x136   : > { %v724_v50 = vmul.f32 %v1897_v44, %v719_v47  ;;  %v664_v44 = vand.u32 127, %v661_v42 }
 0x138   : > { %v729_v52 = vadd.f32 %v1898_v49, %v724_v50  ;;  %vm2236_vm11 = vcmp.le.s32.totalorder %v664_v44, %v662_v43 }
 0x13a   : > { %v730_v53 = vpack.c.bf16 %v729_v52, %v728_v51 }
 0x13c   : > { %1774 = vmatmul.msk.bf16.vlgmr.msra.gmra.mxu0 %vm668_vm1, %v730_v53 }
 0x1b9   : > { %v763_v55 = vpop.f32.mrf.mxu0 }
 0x1ba   : > { %v764_v56 = vadd.f32 %v1899_v54, %v763_v55 }
 0x1bc   : > { %v768_v57 = vpack.c.bf16 %v764_v56, %v764_v56 }
 0x1be   : > { %780 = vrot.lane.b32.xlu1 %v768_v57, %s1984_s15  ;;  %772 = vrot.lane.b32.xlu2 %v768_v57, %s1985_s18  ;;  %v784_v63 = vunpack.c.l.b16 %v768_v57 }
 0x1c0   : > { %v785_v0 = vpack.c.b16 %v784_v63, %v784_v63 }
 0x1c1   : > { %v765_v58 = vpop.f32.mrf.mxu0 }
 0x1c2   : > { %v766_v59 = vadd.f32 %v1899_v54, %v765_v58 }
 0x1c4   : > { %v769_v60 = vpack.c.bf16 %v766_v59, %v766_v59 }
 0x1c6   : > { %778 = vrot.lane.b32.xlu0 %v769_v60, %s1986_s17  ;;  %774 = vrot.lane.b32.xlu2 %v769_v60, %s1985_s18  ;;  %v808_v61 = vunpack.c.l.b16 %v769_v60 }
 0x1c8   : > { %v809_v62 = vpack.c.b16 %v808_v61, %v808_v61 }
 0x1ce   : > { %776 = vrot.lane.b32.xlu2 %v768_v57, %s1986_s17 }
 0x1d6   : > { %782 = vrot.lane.b32.xlu2 %v769_v60, %s1984_s15 }
 0x1de   : > { %810 = vrot.lane.b32.xlu2 %v809_v62, %s1987_s30 }
 0x1e6   : > { %786 = vrot.lane.b32.xlu2 %v785_v0, %s1987_s30 }
 0x218   : > { %v773_v1 = vpop.permute.xlu2 %772 }
 0x219   : > { %v831_v3 = vunpack.c.l.b16 %v773_v1 }
 0x21b   : > { %v832_v5 = vpack.c.b16 %v831_v3, %v831_v3 }
 0x21d   : > { %833 = vrot.lane.b32.xlu0 %v832_v5, %s1987_s30 }
 0x220   : > { %v775_v6 = vpop.permute.xlu2 %774 }
 0x221   : > { %v854_v7 = vunpack.c.l.b16 %v775_v6 }
 0x223   : > { %v2194_v8 = vpack.c.b16 %v854_v7, %v854_v7 }
 0x225   : > { %856 = vrot.lane.b32.xlu1 %v2194_v8, %s1987_s30 }
 0x228   : > { %v777_v9 = vpop.permute.xlu2 %776 }
 0x229   : > { %v877_v10 = vunpack.c.l.b16 %v777_v9 }
 0x22b   : > { %v2198_v11 = vpack.c.b16 %v877_v10, %v877_v10 }
 0x22d   : > { %879 = vrot.lane.b32.xlu1 %v2198_v11, %s1987_s30 }
 0x230   : > { %v781_v13 = vpop.permute.xlu1 %780  ;;  %v783_v14 = vpop.permute.xlu2 %782 }
 0x231   : > { %v923_v15 = vunpack.c.l.b16 %v781_v13  ;;  %v946_v22 = vunpack.c.l.b16 %v783_v14 }
 0x233   : > { %v2202_v16 = vpack.c.b16 %v923_v15, %v923_v15  ;;  %v2215_v25 = vpack.c.b16 %v946_v22, %v946_v22 }
 0x235   : > { %1118 = vrot.lane.b32.xlu1 %v832_v5, %s1988_s21  ;;  %925 = vrot.lane.b32.xlu2 %v2202_v16, %s1987_s30 }
 0x238   : > { %v779_v17 = vpop.permute.xlu0 %778  ;;  %v811_v18 = vpop.permute.xlu2 %810 }
 0x239   : > { %v900_v19 = vunpack.c.l.b16 %v779_v17  ;;  %v816_v20 = vsel %vm788_vm9, %v811_v18, 0 }
 0x23a   : > { %825 = vmatpush.bf16.xpose.msra.mxu2 %v816_v20 }
 0x23b   : > { %v2208_v21 = vpack.c.b16 %v900_v19, %v900_v19 }
 0x23d   : > { %902 = vrot.lane.b32.xlu0 %v2208_v21, %s1987_s30  ;;  %1097 = vrot.lane.b32.xlu2 %v809_v62, %s1988_s21 }
 0x240   : > { %v787_v23 = vpop.permute.xlu2 %786 }
 0x241   : > { %1776 = vmatmul.msk.bf16.vlgmr.msra.gmra.mxu2 %vm788_vm9, %v769_v60  ;;  %v793_v24 = vsel %vm788_vm9, %v787_v23, 0 }
 0x242   : > { %802 = vmatpush.bf16.xpose.msra.mxu1 %v793_v24 }
 0x245   : > { %948 = vrot.lane.b32.xlu0 %v2215_v25, %s1987_s30 }
 0x249   : > { %1775 = vmatmul.msk.bf16.vlgmr.msra.gmra.mxu1 %vm788_vm9, %v768_v57 }
 0x24d   : > { %1075 = vrot.lane.b32.xlu0 %v785_v0, %s1988_s21 }
 0x28f   : > { %v834_v26 = vpop.permute.xlu0 %833  ;;  %v926_v27 = vpop.permute.xlu2 %925 }
 0x290   : > { %v839_v28 = vsel %vm788_vm9, %v834_v26, 0  ;;  %v931_v29 = vsel %vm788_vm9, %v926_v27, 0 }
 0x291   : > { %848 = vmatpush.bf16.xpose.msra.mxu3 %v839_v28 }
 0x297   : > { %v857_v30 = vpop.permute.xlu1 %856  ;;  %v1098_v36 = vpop.permute.xlu2 %1097 }
 0x298   : > { %1777 = vmatmul.msk.bf16.vlgmr.msra.gmra.mxu3 %vm788_vm9, %v773_v1  ;;  %v862_v31 = vsel %vm788_vm9, %v857_v30, 0  ;;  %v1103_v39 = vsel %vm1080_vm10, %v1098_v36, 0 }
 0x299   : > { %940 = vmatpush.bf16.xpose.msrb.mxu3 %v931_v29  ;;  %871 = vmatpush.bf16.xpose.msrb.mxu0 %v862_v31 }
 0x29f   : > { %v880_v32 = vpop.permute.xlu1 %879 }
 0x2a0   : > { %1778 = vmatmul.msk.bf16.vlgmr.msrb.gmra.mxu0 %vm788_vm9, %v775_v6  ;;  %v885_v33 = vsel %vm788_vm9, %v880_v32, 0 }
 0x2a1   : > { %894 = vmatpush.bf16.xpose.msrb.mxu1 %v885_v33 }
 0x2a7   : > { %v1119_v34 = vpop.permute.xlu1 %1118 }
 0x2a8   : > { %v1124_v35 = vsel %vm1080_vm10, %v1119_v34, 0  ;;  %1779 = vmatmul.msk.bf16.vlgmr.msrb.gmra.mxu1 %vm788_vm9, %v777_v9  ;;  %1781 = vmatmul.msk.bf16.vlgmr.msrb.gmra.mxu3 %vm788_vm9, %v781_v13 }
 0x2a9   : > { %1133 = vmatpush.bf16.msra.mxu3 %v1124_v35 }
 0x2af   : > { %v903_v37 = vpop.permute.xlu0 %902 }
 0x2b0   : > { %v908_v38 = vsel %vm788_vm9, %v903_v37, 0 }
 0x2b1   : > { %917 = vmatpush.bf16.xpose.msrb.mxu2 %v908_v38 }
 0x2b7   : > { %v949_v40 = vpop.permute.xlu0 %948 }
 0x2b8   : > { %v954_v41 = vsel %vm788_vm9, %v949_v40, 0  ;;  %1780 = vmatmul.msk.bf16.vlgmr.msrb.gmra.mxu2 %vm788_vm9, %v779_v17 }
 0x2b9   : > { %1112 = vmatpush.bf16.msra.mxu2 %v1103_v39  ;;  %963 = vmatpush.bf16.xpose.msra.mxu0 %v954_v41 }
 0x2bf   : > { %v1076_v45 = vpop.permute.xlu0 %1075 }
 0x2c0   : > { %v1082_v46 = vsel %vm1080_vm10, %v1076_v45, 0  ;;  %1782 = vmatmul.msk.bf16.vlgmr.msra.gmra.mxu0 %vm788_vm9, %v783_v14 }
 0x2c1   : > { %1091 = vmatpush.bf16.msra.mxu1 %v1082_v46 }
 0x2c4   : > { %v827_v48 = vpop.f32.mrf.mxu2 }
 0x2c5   : > { %v972_v49 = vsel %vm2236_vm11, %v827_v48, -1e+30 }
 0x2c6   : > { %v804_v50 = vpop.f32.mrf.mxu1  ;;  %v982_v51 = vsel %vm788_vm9, %v972_v49, -inf }
 0x2c7   : > { %v971_v52 = vsel %vm2236_vm11, %v804_v50, -1e+30  ;;  %983 = vmax.xlane.f32.xlu2 %v982_v51 }
 0x2c8   : > { %v979_v53 = vsel %vm788_vm9, %v971_v52, -inf }
 0x2c9   : > { %980 = vmax.xlane.f32.xlu0 %v979_v53 }
 0x2cc   : > { %v829_v54 = vpop.f32.mrf.mxu2 }
 0x2ce   : > { %v806_v55 = vpop.f32.mrf.mxu1 }
 0x31b   : > { %v850_v56 = vpop.f32.mrf.mxu3 }
 0x31c   : > { %v973_v57 = vsel %vm2236_vm11, %v850_v56, -1e+30 }
 0x31d   : > { %v873_v58 = vpop.f32.mrf.mxu0  ;;  %v985_v59 = vsel %vm788_vm9, %v973_v57, -inf }
 0x31e   : > { %986 = vmax.xlane.f32.xlu1 %v985_v59  ;;  %v974_v3 = vsel %vm2236_vm11, %v873_v58, -1e+30 }
 0x31f   : > { %v988_v9 = vsel %vm788_vm9, %v974_v3, -inf }
 0x323   : > { %v852_v60 = vpop.f32.mrf.mxu3 }
 0x325   : > { %v875_v61 = vpop.f32.mrf.mxu0  ;;  %v896_v62 = vpop.f32.mrf.mxu1 }
 0x326   : > { %v975_v63 = vsel %vm2236_vm11, %v896_v62, -1e+30 }
 0x327   : > { %v991_v0 = vsel %vm788_vm9, %v975_v63, -inf }
 0x328   : > { %992 = vmax.xlane.f32.xlu2 %v991_v0 }
 0x32b   : > { %v942_v1 = vpop.f32.mrf.mxu3 }
 0x32c   : > { %v977_v5 = vsel %vm2236_vm11, %v942_v1, -1e+30 }
 0x32d   : > { %v898_v6 = vpop.f32.mrf.mxu1  ;;  %v997_v7 = vsel %vm788_vm9, %v977_v5, -inf }
 0x32e   : > { %998 = vmax.xlane.f32.xlu0 %v997_v7 }
 0x330   : > { %989 = vmax.xlane.f32.xlu2 %v988_v9 }
 0x333   : > { %v944_v10 = vpop.f32.mrf.mxu3 }
 0x33a   : > { %v984_v13 = vpop.xlane.xlu2 %983 }
 0x33b   : > { %v1004_v14 = vsub.f32 %v972_v49, %v984_v13  ;;  %v919_v15 = vpop.f32.mrf.mxu2 }
 0x33c   : > { %v981_v17 = vpop.xlane.xlu0 %980  ;;  %v976_v30 = vsel %vm2236_vm11, %v919_v15, -1e+30 }
 0x33d   : > { %v1013_v18 = vmul.f32 1.442695, %v1004_v14  ;;  %v1003_v19 = vsub.f32 %v971_v52, %v981_v17  ;;  %v965_v20 = vpop.f32.mrf.mxu0  ;;  %v994_v31 = vsel %vm788_vm9, %v976_v30, -inf }
 0x33e   : > { %v978_v32 = vsel %vm2236_vm11, %v965_v20, -1e+30 }
 0x33f   : > { %1911 = vpow2.f32 %v1013_v18  ;;  %v1011_v22 = vmul.f32 1.442695, %v1003_v19  ;;  %v1000_v33 = vsel %vm788_vm9, %v978_v32, -inf }
 0x341   : > { %1913 = vpow2.f32 %v1011_v22 }
 0x343   : > { %v921_v23 = vpop.f32.mrf.mxu2 }
 0x345   : > { %v1912_v24 = vpop.eup %1911  ;;  %v967_v26 = vpop.f32.mrf.mxu0 }
 0x346   : > { %v1030_v27 = vsel %vm788_vm9, %v1912_v24, 0.0 }
 0x347   : > { %v1914_v28 = vpop.eup %1913  ;;  %1031 = vadd.xlane.f32.xlu0 %v1030_v27 }
 0x348   : > { %1139 = vrot.lane.b32.xlu2 %v2194_v8, %s1988_s21  ;;  %v1027_v29 = vsel %vm788_vm9, %v1914_v28, 0.0 }
 0x349   : > { %1028 = vadd.xlane.f32.xlu1 %v1027_v29 }
 0x351   : > { %995 = vmax.xlane.f32.xlu1 %v994_v31 }
 0x359   : > { %1001 = vmax.xlane.f32.xlu1 %v1000_v33 }
 0x372   : > { %1181 = vrot.lane.b32.xlu1 %v2208_v21, %s1988_s21 }
 0x391   : > { %v987_v34 = vpop.xlane.xlu1 %986 }
 0x392   : > { %v1005_v36 = vsub.f32 %v973_v57, %v987_v34 }
 0x394   : > { %v1015_v38 = vmul.f32 1.442695, %v1005_v36 }
 0x39b   : > { %v993_v8 = vpop.xlane.xlu2 %992 }
 0x39c   : > { %v1007_v35 = vsub.f32 %v975_v63, %v993_v8 }
 0x39e   : > { %v1019_v37 = vmul.f32 1.442695, %v1007_v35 }
 0x3a0   : > { %1915 = vpow2.f32 %v1019_v37 }
 0x3a1   : > { %v999_v39 = vpop.xlane.xlu0 %998  ;;  %1917 = vpow2.f32 %v1015_v38 }
 0x3a2   : > { %v1009_v40 = vsub.f32 %v977_v5, %v999_v39 }
 0x3a3   : > { %v990_v41 = vpop.xlane.xlu2 %989 }
 0x3a4   : > { %v1023_v42 = vmul.f32 1.442695, %v1009_v40  ;;  %v1006_v43 = vsub.f32 %v974_v3, %v990_v41 }
 0x3a6   : > { %v2270_v44 = vpop.eup %1915  ;;  %1919 = vpow2.f32 %v1023_v42  ;;  %v1017_v45 = vmul.f32 1.442695, %v1006_v43 }
 0x3a7   : > { %v1039_v21 = vsel %vm788_vm9, %v2270_v44, 0.0  ;;  %v1918_v46 = vpop.eup %1917 }
 0x3a8   : > { %1921 = vpow2.f32 %v1017_v45  ;;  %1040 = vadd.xlane.f32.xlu2 %v1039_v21  ;;  %v1033_v52 = vsel %vm788_vm9, %v1918_v46, 0.0 }
 0x3ab   : > { %v1140_v47 = vpop.permute.xlu2 %1139 }
 0x3ac   : > { %v1920_v48 = vpop.eup %1919  ;;  %v1145_v49 = vsel %vm1080_vm10, %v1140_v47, 0 }
 0x3ad   : > { %1154 = vmatpush.bf16.msrb.mxu0 %v1145_v49  ;;  %v1045_v50 = vsel %vm788_vm9, %v1920_v48, 0.0 }
 0x3ae   : > { %v1922_v51 = vpop.eup %1921  ;;  %1046 = vadd.xlane.f32.xlu1 %v1045_v50 }
 0x3af   : > { %v1036_v53 = vsel %vm788_vm9, %v1922_v51, 0.0 }
 0x3b0   : > { %1034 = vadd.xlane.f32.xlu2 %v1033_v52  ;;  %1037 = vadd.xlane.f32.xlu0 %v1036_v53 }
 0x3ba   : > { %v1032_v54 = vpop.xlane.xlu0 %1031 }
 0x3bb   : > { %1923 = vrcp.f32 %v1032_v54 }
 0x3bc   : > { %v1029_v55 = vpop.xlane.xlu1 %1028 }
 0x3bd   : > { %1925 = vrcp.f32 %v1029_v55 }
 0x3c1   : > { %v1924_v56 = vpop.eup %1923 }
 0x3c2   : > { %v1060_v57 = vmul.f32 %v1924_v56, %v1912_v24 }
 0x3c3   : > { %v1926_v58 = vpop.eup %1925 }
 0x3c4   : > { %v1068_v59 = vpack.c.bf16 %v1060_v57, %v1060_v57  ;;  %v1059_v60 = vmul.f32 %v1926_v58, %v1914_v28  ;;  %v996_v61 = vpop.xlane.xlu1 %995 }
 0x3c5   : > { %v1008_v62 = vsub.f32 %v976_v30, %v996_v61 }
 0x3c6   : > { %v1067_v63 = vpack.c.bf16 %v1059_v60, %v1059_v60  ;;  %1784 = vmatmul.msk.bf16.vlgmr.msra.gmra.mxu2 %vm788_vm9, %v1068_v59 }
 0x3c7   : > { %v1021_v0 = vmul.f32 1.442695, %v1008_v62  ;;  %1223 = vrot.lane.b32.xlu1 %v2215_v25, %s1988_s21 }
 0x3c8   : > { %1783 = vmatmul.msk.bf16.vlgmr.msra.gmra.mxu1 %vm788_vm9, %v1067_v63  ;;  %1202 = vrot.lane.b32.xlu2 %v2202_v16, %s1988_s21 }
 0x3c9   : > { %1927 = vpow2.f32 %v1021_v0 }
 0x3cc   : > { %v1002_v1 = vpop.xlane.xlu1 %1001 }
 0x3cd   : > { %v1010_v3 = vsub.f32 %v978_v32, %v1002_v1 }
 0x3cf   : > { %v1928_v5 = vpop.eup %1927  ;;  %v1025_v6 = vmul.f32 1.442695, %v1010_v3 }
 0x3d0   : > { %v1042_v7 = vsel %vm788_vm9, %v1928_v5, 0.0 }
 0x3d1   : > { %1929 = vpow2.f32 %v1025_v6  ;;  %1043 = vadd.xlane.f32.xlu0 %v1042_v7 }
 0x3d7   : > { %v1930_v9 = vpop.eup %1929 }
 0x3d8   : > { %v1048_v10 = vsel %vm788_vm9, %v1930_v9, 0.0 }
 0x3d9   : > { %1049 = vadd.xlane.f32.xlu0 %v1048_v10 }
 0x3e4   : > { %v1182_v13 = vpop.permute.xlu1 %1181 }
 0x3e5   : > { %v1187_v25 = vsel %vm1080_vm10, %v1182_v13, 0 }
 0x3e6   : > { %1196 = vmatpush.bf16.msrb.mxu2 %v1187_v25 }
 0x3ed   : > { %1160 = vrot.lane.b32.xlu0 %v2198_v11, %s1988_s21 }
 0x41b   : > { %v1041_v16 = vpop.xlane.xlu2 %1040 }
 0x421   : > { %v1047_v26 = vpop.xlane.xlu1 %1046 }
 0x423   : > { %v1038_v14 = vpop.xlane.xlu0 %1037  ;;  %v1035_v15 = vpop.xlane.xlu2 %1034 }
 0x424   : > { %1931 = vrcp.f32 %v1038_v14 }
 0x425   : > { %1933 = vrcp.f32 %v1035_v15 }
 0x426   : > { %1935 = vrcp.f32 %v1047_v26 }
 0x42a   : > { %v1932_v17 = vpop.eup %1931 }
 0x42b   : > { %v1934_v18 = vpop.eup %1933  ;;  %v1062_v19 = vmul.f32 %v1932_v17, %v1922_v51  ;;  %v1203_v20 = vpop.permute.xlu2 %1202  ;;  %v1852_v17 = vld [vmem:[%s2418_s24 + $0x8] sm:$0xff] }
 0x42c   : > { %v1061_v22 = vmul.f32 %v1934_v18, %v1918_v46  ;;  %v1208_v23 = vsel %vm1080_vm10, %v1203_v20, 0  ;;  %v1936_v11 = vpop.eup %1935  ;;  %v1851_v18 = vld [vmem:[%s2418_s24] sm:$0xff] }
 0x42d   : > { %v1070_v24 = vpack.c.bf16 %v1062_v19, %v1062_v19  ;;  %1217 = vmatpush.bf16.msrb.mxu3 %v1208_v23  ;;  %v1065_v29 = vmul.f32 %v1936_v11, %v1920_v48 }
 0x42e   : > { %v1069_v27 = vpack.c.bf16 %v1061_v22, %v1061_v22 }
 0x42f   : > { %1786 = vmatmul.msk.bf16.vlgmr.msrb.gmra.mxu0 %vm788_vm9, %v1070_v24  ;;  %v1073_v31 = vpack.c.bf16 %v1065_v29, %v1065_v29 }
 0x430   : > { %1785 = vmatmul.msk.bf16.vlgmr.msra.gmra.mxu3 %vm788_vm9, %v1069_v27 }
 0x439   : > { %v1224_v28 = vpop.permute.xlu1 %1223 }
 0x43a   : > { %v1229_v30 = vsel %vm1080_vm10, %v1224_v28, 0 }
 0x43b   : > { %1238 = vmatpush.bf16.msra.mxu0 %v1229_v30 }
 0x440   : > { %1789 = vmatmul.msk.bf16.vlgmr.msrb.gmra.mxu3 %vm788_vm9, %v1073_v31 }
 0x444   : > { %v1044_v32 = vpop.xlane.xlu0 %1043 }
 0x445   : > { %1937 = vrcp.f32 %v1044_v32  ;;  %v2294_v33 = vpop.f32.mrf.mxu1 }
 0x446   : > { %v1244_v23 = vpack.c.bf16 %v2294_v33, %v2294_v33 }
 0x449   : > { %v2296_v34 = vpop.f32.mrf.mxu2 }
 0x44a   : > { %v1245_v27 = vpack.c.bf16 %v2296_v34, %v2296_v34 }
 0x44b   : > { %v1938_v8 = vpop.eup %1937 }
 0x44c   : > { %v1064_v35 = vmul.f32 %v1938_v8, %v1928_v5  ;;  %v1050_v36 = vpop.xlane.xlu0 %1049 }
 0x44d   : > { %1939 = vrcp.f32 %v1050_v36  ;;  %v1095_v37 = vpop.f32.mrf.mxu1 }
 0x44e   : > { %v1072_v38 = vpack.c.bf16 %v1064_v35, %v1064_v35  ;;  %1941 = vrcp.f32 %v1041_v16  ;;  %v1900_v37 = vld [vmem:[%s2419_s27] ss:$0 sm:$0xff] }
 0x450   : > { %1788 = vmatmul.msk.bf16.vlgmr.msrb.gmra.mxu2 %vm788_vm9, %v1072_v38 }
 0x451   : > { %v1116_v39 = vpop.f32.mrf.mxu2 }
 0x453   : > { %v1940_v40 = vpop.eup %1939 }
 0x454   : > { %v1066_v41 = vmul.f32 %v1940_v40, %v1930_v9  ;;  %v1942_v43 = vpop.eup %1941 }
 0x455   : > { %v1063_v45 = vmul.f32 %v1942_v43, %v2270_v44 }
 0x456   : > { %v1074_v42 = vpack.c.bf16 %v1066_v41, %v1066_v41 }
 0x457   : > { %v1071_v47 = vpack.c.bf16 %v1063_v45, %v1063_v45 }
 0x458   : > { %1790 = vmatmul.msk.bf16.vlgmr.msra.gmra.mxu0 %vm788_vm9, %v1074_v42 }
 0x45f   : > { %v1161_v21 = vpop.permute.xlu0 %1160 }
 0x460   : > { %v1166_v46 = vsel %vm1080_vm10, %v1161_v21, 0 }
 0x461   : > { %1175 = vmatpush.bf16.msrb.mxu1 %v1166_v46 }
 0x464   : > { %1787 = vmatmul.msk.bf16.vlgmr.msrb.gmra.mxu1 %vm788_vm9, %v1071_v47 }
 0x465   : > { %1332 = vmatpush.bf16.msra.mxu1 %v1852_v17 }
 0x469   : > { %1333 = vmatpush.bf16.msra.mxu1 %v1851_v18 }
 0x4ac   : > { %v1156_v48 = vpop.f32.mrf.mxu0 }
 0x4ad   : > { %v1247_v49 = vpack.c.bf16 %v1156_v48, %v1156_v48 }
 0x4af   : > { %v1255_v50 = vunpack.c.l.b16 %v1247_v49 }
 0x4b1   : > { %v1257_v51 = vpack.c.b16 %v1255_v50, %v1255_v50 }
 0x4b3   : > { %v1135_v52 = vpop.f32.mrf.mxu3  ;;  %1260 = vrot.lane.b32.xlu2 %v1257_v51, %s1989_s23 }
 0x4b4   : > { %v1246_v53 = vpack.c.bf16 %v1135_v52, %v1135_v52  ;;  %v1158_v54 = vpop.f32.mrf.mxu0 }
 0x4b6   : > { %v1254_v55 = vunpack.c.l.b16 %v1246_v53  ;;  %v1854_v53 = vld [vmem:[%s2121_s3 + $0x8] sm:$0xff] }
 0x4b7   : > { %1428 = vmatpush.bf16.msra.mxu2 %v1854_v53 }
 0x4b8   : > { %v1256_v56 = vpack.c.b16 %v1254_v55, %v1254_v55 }
 0x4ba   : > { %1258 = vrot.lane.b32.xlu0 %v1256_v56, %s1989_s23 }
 0x4bb   : > { %v1137_v44 = vpop.f32.mrf.mxu3 }
 0x4bc   : > { %v1853_v44 = vld [vmem:[%s2121_s3] sm:$0xff] }
 0x4bd   : > { %1429 = vmatpush.bf16.msra.mxu2 %v1853_v44 }
 0x4c3   : > { %v1219_v57 = vpop.f32.mrf.mxu3 }
 0x4c4   : > { %v1250_v58 = vpack.c.bf16 %v1219_v57, %v1219_v57 }
 0x4c6   : > { %v1274_v59 = vunpack.c.l.b16 %v1250_v58 }
 0x4c8   : > { %v1276_v60 = vpack.c.b16 %v1274_v59, %v1274_v59 }
 0x4ca   : > { %1278 = vrot.lane.b32.xlu2 %v1276_v60, %s1990_s19 }
 0x4cb   : > { %v1221_v61 = vpop.f32.mrf.mxu3 }
 0x4d3   : > { %v1198_v62 = vpop.f32.mrf.mxu2 }
 0x4d4   : > { %v1249_v63 = vpack.c.bf16 %v1198_v62, %v1198_v62 }
 0x4d5   : > { %v1240_v0 = vpop.f32.mrf.mxu0 }
 0x4d6   : > { %v1265_v1 = vunpack.c.l.b16 %v1249_v63  ;;  %v1251_v13 = vpack.c.bf16 %v1240_v0, %v1240_v0 }
 0x4d8   : > { %v1267_v3 = vpack.c.b16 %v1265_v1, %v1265_v1  ;;  %v1275_v14 = vunpack.c.l.b16 %v1251_v13 }
 0x4da   : > { %1270 = vrot.lane.b32.xlu0 %v1267_v3, %s1991_s28  ;;  %v1277_v15 = vpack.c.b16 %v1275_v14, %v1275_v14  ;;  %v1902_v14 = vld [vmem:[%s625_s22] ss:$0 sm:$0xff] }
 0x4db   : > { %v1200_v5 = vpop.f32.mrf.mxu2 }
 0x4dd   : > { %v1242_v6 = vpop.f32.mrf.mxu0 }
 0x4e1   : > { %v1177_v7 = vpop.f32.mrf.mxu1 }
 0x4e2   : > { %v1248_v9 = vpack.c.bf16 %v1177_v7, %v1177_v7 }
 0x4e4   : > { %v1264_v10 = vunpack.c.l.b16 %v1248_v9 }
 0x4e6   : > { %v1266_v25 = vpack.c.b16 %v1264_v10, %v1264_v10 }
 0x4e8   : > { %1268 = vrot.lane.b32.xlu1 %v1266_v25, %s1991_s28 }
 0x4e9   : > { %v1179_v16 = vpop.f32.mrf.mxu1 }
 0x4f0   : > { %1280 = vrot.lane.b32.xlu1 %v1277_v15, %s1990_s19 }
 0x50d   : > { %v1261_v20 = vpop.permute.xlu2 %1260 }
 0x50e   : > { %v1287_v29 = vsel %vm788_vm9, %v1245_v27, %v1261_v20 }
 0x524   : > { %v1279_v28 = vpop.permute.xlu2 %1278 }
 0x52c   : > { %v1259_v19 = vpop.permute.xlu0 %1258 }
 0x52d   : > { %v1284_v24 = vsel %vm788_vm9, %v1244_v23, %v1259_v19  ;;  %v1862_v23 = vld [vmem:[%s2131_s16 + $0x38] sm:$0xff] }
 0x52e   : > { %1549 = vmatpush.bf16.msra.mxu3 %v1862_v23 }
 0x54c   : > { %v1271_v11 = vpop.permute.xlu0 %1270 }
 0x54d   : > { %v1292_v31 = vsel %vm1288_vm12, %v1287_v29, %v1271_v11  ;;  %v1860_v29 = vld [vmem:[%s2131_s16 + $0x28] sm:$0xff] }
 0x55a   : > { %v1269_v22 = vpop.permute.xlu1 %1268 }
 0x55b   : > { %v1290_v26 = vsel %vm1288_vm12, %v1284_v24, %v1269_v22  ;;  %v1903_v24 = vld [vmem:[%s633_s5] ss:$0 sm:$0xff] }
 0x55c   : > { %v1295_v30 = vsel %vm1293_vm13, %v1290_v26, %v1279_v28  ;;  %v1861_v26 = vld [vmem:[%s2131_s16 + $0x30] sm:$0xff] }
 0x55d   : > { %v1308_v35 = vunpack.c.l.b16 %v1295_v30  ;;  %1550 = vmatpush.bf16.msra.mxu3 %v1861_v26 }
 0x561   : > { %1551 = vmatpush.bf16.msra.mxu3 %v1860_v29 }
 0x562   : > { %v1281_v32 = vpop.permute.xlu1 %1280 }
 0x563   : > { %v1297_v8 = vsel %vm1293_vm13, %v1292_v31, %v1281_v32  ;;  %v1859_v32 = vld [vmem:[%s2131_s16 + $0x20] sm:$0xff] }
 0x564   : > { %v1309_v36 = vunpack.c.l.b16 %v1297_v8 }
 0x565   : > { %1552 = vmatpush.bf16.msra.mxu3 %v1859_v32 }
 0x566   : > { %v1310_v33 = vpack.c.b16 %v1309_v36, %v1308_v35 }
 0x568   : > { %1799 = vmatmul.msk.bf16.vlgmr.msra.gmra.mxu1 %vm668_vm1, %v1310_v33 }
 0x5e5   : > { %v1335_v38 = vpop.f32.mrf.mxu1 }
 0x5e6   : > { %v1336_v34 = vadd.f32 %v1900_v37, %v1335_v38  ;;  %v1858_v38 = vld [vmem:[%s2131_s16 + $0x18] sm:$0xff] }
 0x5e7   : > { %1553 = vmatpush.bf16.msra.mxu3 %v1858_v38 }
 0x5e8   : > { %v2318_v39 = vadd.f32 %v1336_v34, %v2152_v2 }
 0x5ea   : > { %v1344_v40 = vsel %vm668_vm1, %v2318_v39, 0.0 }
 0x5eb   : > { %1345 = vadd.xlane.f32.xlu0 %v1344_v40 }
 0x5ed   : > { %v1337_v41 = vpop.f32.mrf.mxu1 }
 0x5ee   : > { %v1338_v42 = vadd.f32 %v1900_v37, %v1337_v41 }
 0x5f0   : > { %v2323_v43 = vadd.f32 %v1338_v42, %v2159_v4 }
 0x5f2   : > { %v1347_v45 = vsel %vm668_vm1, %v2323_v43, 0.0 }
 0x5f3   : > { %1348 = vadd.xlane.f32.xlu2 %v1347_v45  ;;  %v1857_v45 = vld [vmem:[%s2131_s16 + $0x10] sm:$0xff] }
 0x5f4   : > { %1554 = vmatpush.bf16.msra.mxu3 %v1857_v45 }
 0x65e   : > { %v1346_v21 = vpop.xlane.xlu0 %1345 }
 0x65f   : > { %v1350_v46 = vmul.f32 %v1346_v21, %v2163_v12 }
 0x661   : > { %v1352_v2 = vsub.f32 %v2318_v39, %v1350_v46 }
 0x663   : > { %v1354_v47 = vmul.f32 %v1352_v2, %v1352_v2 }
 0x665   : > { %v1356_v48 = vsel %vm668_vm1, %v1354_v47, 0.0 }
 0x666   : > { %v1349_v49 = vpop.xlane.xlu2 %1348  ;;  %1357 = vadd.xlane.f32.xlu1 %v1356_v48 }
 0x667   : > { %v1351_v50 = vmul.f32 %v1349_v49, %v2163_v12 }
 0x669   : > { %v1353_v4 = vsub.f32 %v2323_v43, %v1351_v50  ;;  %v1855_v50 = vld [vmem:[%s2131_s16] sm:$0xff] }
 0x66b   : > { %v1355_v51 = vmul.f32 %v1353_v4, %v1353_v4 }
 0x66d   : > { %v1359_v52 = vsel %vm668_vm1, %v1355_v51, 0.0 }
 0x66e   : > { %1360 = vadd.xlane.f32.xlu0 %v1359_v52 }
 0x6d9   : > { %v1358_v54 = vpop.xlane.xlu1 %1357 }
 0x6da   : > { %v1362_v55 = vmul.f32 %v1358_v54, %v2163_v12 }
 0x6dc   : > { %v1364_v56 = vadd.f32 1e-05, %v1362_v55 }
 0x6de   : > { %1943 = vrsqrt.f32 %v1364_v56  ;;  %vm1372_vm15 = vweird.f32 %v1364_v56 }
 0x6e1   : > { %v1361_v57 = vpop.xlane.xlu0 %1360 }
 0x6e2   : > { %v1363_v58 = vmul.f32 %v1361_v57, %v2163_v12  ;;  %v1901_v12 = vld [vmem:[%s622_s2] ss:$0 sm:$0xff] }
 0x6e4   : > { %v1944_v59 = vpop.eup %1943  ;;  %v1365_v60 = vadd.f32 1e-05, %v1363_v58 }
 0x6e5   : > { %v1367_v61 = vmul.f32 %v1944_v59, %v1364_v56  ;;  %vm1373_vm14 = vweird.f32 %v1944_v59 }
 0x6e6   : > { %1945 = vrsqrt.f32 %v1365_v60  ;;  %vm1374_vm0 = vmor %vm1372_vm15, %vm1373_vm14  ;;  %vm1382_vm3 = vweird.f32 %v1365_v60 }
 0x6e7   : > { %v1368_v62 = vmul.f32 %v1944_v59, %v1367_v61  ;;  %v1992_v61 = vmov 1065369472  }
 0x6e9   : > { %v1369_v63 = vmul.f32 0.5, %v1368_v62  ;;  %v1460_v62 = vunpack.c.h.bf16 %v1992_v61 }
 0x6eb   : > { %v1370_v0 = vsub.f32 1.5, %v1369_v63  ;;  %v1461_v63 = vunpack.c.l.bf16 %v1992_v61 }
 0x6ec   : > { %v1946_v1 = vpop.eup %1945 }
 0x6ed   : > { %v1371_v3 = vmul.f32 %v1944_v59, %v1370_v0  ;;  %v1377_v5 = vmul.f32 %v1946_v1, %v1365_v60  ;;  %vm1383_vm2 = vweird.f32 %v1946_v1 }
 0x6ee   : > { %vm1384_vm4 = vmor %vm1382_vm3, %vm1383_vm2 }
 0x6ef   : > { %v1378_v6 = vmul.f32 %v1946_v1, %v1377_v5  ;;  %v1375_v7 = vsel %vm1374_vm0, %v1944_v59, %v1371_v3 }
 0x6f0   : > { %v1386_v13 = vmul.f32 %v1375_v7, %v1352_v2  ;;  %v1856_v2 = vld [vmem:[%s2131_s16 + $0x8] sm:$0xff] }
 0x6f1   : > { %v1379_v9 = vmul.f32 0.5, %v1378_v6  ;;  %1555 = vmatpush.bf16.msra.mxu3 %v1856_v2 }
 0x6f2   : > { %v1391_v15 = vmul.f32 %v1901_v12, %v1386_v13 }
 0x6f3   : > { %v1380_v10 = vsub.f32 1.5, %v1379_v9 }
 0x6f4   : > { %v1396_v19 = vadd.f32 %v1902_v14, %v1391_v15 }
 0x6f5   : > { %v1381_v25 = vmul.f32 %v1946_v1, %v1380_v10  ;;  %1556 = vmatpush.bf16.msra.mxu3 %v1855_v50 }
 0x6f7   : > { %v1385_v16 = vsel %vm1384_vm4, %v1946_v1, %v1381_v25 }
 0x6f8   : > { %v1387_v17 = vmul.f32 %v1385_v16, %v1353_v4 }
 0x6fa   : > { %v1392_v18 = vmul.f32 %v1901_v12, %v1387_v17 }
 0x6fc   : > { %v1397_v20 = vadd.f32 %v1902_v14, %v1392_v18 }
 0x6fe   : > { %v1398_v22 = vpack.c.bf16 %v1397_v20, %v1396_v19  ;;  %v1904_v19 = vld [vmem:[%s641_s20] ss:$0 sm:$0xff] }
 0x700   : > { %1808 = vmatmul.msk.bf16.vlgmr.msra.gmra.mxu2 %vm668_vm1, %v1398_v22 }
 0x783   : > { %v1431_v27 = vpop.f32.mrf.mxu2 }
 0x784   : > { %v1432_v11 = vadd.f32 %v1903_v24, %v1431_v27 }
 0x786   : > { %v1436_v28 = vpack.c.bf16 %v1432_v11, %v1432_v11 }
 0x788   : > { %v1438_v30 = vunpack.c.l.bf16 %v1436_v28 }
 0x78a   : > { %v1440_v31 = vmul.f32 1.703125, %v1438_v30 }
 0x78b   : > { %v1433_v8 = vpop.f32.mrf.mxu2 }
 0x78c   : > { %v1442_v35 = vpack.c.bf16 %v1440_v31, %v1440_v31  ;;  %v1434_v36 = vadd.f32 %v1903_v24, %v1433_v8 }
 0x78e   : > { %v1444_v33 = vxor.u32 2147516416, %v1442_v35  ;;  %v1437_v37 = vpack.c.bf16 %v1434_v36, %v1434_v36 }
 0x790   : > { %v1446_v34 = vunpack.c.l.bf16 %v1444_v33  ;;  %v1439_v40 = vunpack.c.l.bf16 %v1437_v37 }
 0x792   : > { %v1448_v41 = vmul.f32 1.442695, %v1446_v34  ;;  %v1441_v42 = vmul.f32 1.703125, %v1439_v40 }
 0x794   : > { %1947 = vpow2.f32 %v1448_v41  ;;  %v1443_v21 = vpack.c.bf16 %v1441_v42, %v1441_v42 }
 0x796   : > { %v1445_v46 = vxor.u32 2147516416, %v1443_v21 }
 0x798   : > { %v1447_v47 = vunpack.c.l.bf16 %v1445_v46 }
 0x79a   : > { %v1948_v48 = vpop.eup %1947  ;;  %v1450_v49 = vmul.f32 1.442695, %v1447_v47 }
 0x79b   : > { %v1452_v4 = vpack.c.bf16 %v1948_v48, %v1948_v48 }
 0x79c   : > { %1949 = vpow2.f32 %v1450_v49 }
 0x79d   : > { %v1454_v51 = vunpack.c.l.bf16 %v1452_v4 }
 0x79f   : > { %v1456_v52 = vadd.f32 1.0, %v1454_v51 }
 0x7a1   : > { %v1458_v53 = vpack.c.bf16 %v1456_v52, %v1456_v52 }
 0x7a2   : > { %v1950_v54 = vpop.eup %1949 }
 0x7a3   : > { %v1462_v55 = vunpack.c.h.bf16 %v1458_v53  ;;  %v1463_v56 = vunpack.c.l.bf16 %v1458_v53  ;;  %v1453_v44 = vpack.c.bf16 %v1950_v54, %v1950_v54 }
 0x7a5   : > { %1951 = vrcp.f32 %v1462_v55  ;;  %v1455_v57 = vunpack.c.l.bf16 %v1453_v44 }
 0x7a6   : > { %1953 = vrcp.f32 %v1463_v56 }
 0x7a7   : > { %v1457_v58 = vadd.f32 1.0, %v1455_v57 }
 0x7a9   : > { %v1459_v59 = vpack.c.bf16 %v1457_v58, %v1457_v58 }
 0x7ab   : > { %v1952_v60 = vpop.eup %1951  ;;  %v1469_v0 = vunpack.c.h.bf16 %v1459_v59  ;;  %v1470_v1 = vunpack.c.l.bf16 %v1459_v59 }
 0x7ac   : > { %v1954_v3 = vpop.eup %1953  ;;  %v1465_v5 = vmul.f32 %v1952_v60, %v1460_v62 }
 0x7ad   : > { %1955 = vrcp.f32 %v1469_v0  ;;  %v1467_v6 = vmul.f32 %v1954_v3, %v1461_v63 }
 0x7ae   : > { %1957 = vrcp.f32 %v1470_v1 }
 0x7af   : > { %v1468_v9 = vpack.c.bf16 %v1465_v5, %v1467_v6 }
 0x7b1   : > { %v1476_v25 = vunpack.c.l.bf16 %v1468_v9 }
 0x7b3   : > { %v1956_v7 = vpop.eup %1955  ;;  %v1478_v15 = vmul.f32 %v1476_v25, %v1438_v30 }
 0x7b4   : > { %v1958_v10 = vpop.eup %1957  ;;  %v1472_v12 = vmul.f32 %v1956_v7, %v1460_v62 }
 0x7b5   : > { %v1474_v13 = vmul.f32 %v1958_v10, %v1461_v63 }
 0x7b7   : > { %v1475_v16 = vpack.c.bf16 %v1472_v12, %v1474_v13 }
 0x7b9   : > { %v1477_v14 = vunpack.c.l.bf16 %v1475_v16 }
 0x7bb   : > { %v1479_v17 = vmul.f32 %v1477_v14, %v1439_v40 }
 0x7bd   : > { %v1480_v18 = vpack.c.bf16 %v1479_v17, %v1478_v15 }
 0x7bf   : > { %1557 = vmatmul.bf16.vlgmr.msra.gmra.mxu3 %v1480_v18 }
 0x842   : > { %v1558_v20 = vpop.f32.mrf.mxu3 }
 0x843   : > { %v1559_v22 = vadd.f32 %v1904_v19, %v1558_v20 }
 0x845   : > { %v1563_v23 = vadd.f32 %v1559_v22, %v2318_v39 }
 0x847   : > { %1565 = vst.msk [vmem:[%s2398_s13] sm:$0xff] %vm668_vm1, %v1563_v23 }
 0x84a   : > { %v1560_v24 = vpop.f32.mrf.mxu3 }
 0x84b   : > { %v1561_v26 = vadd.f32 %v1904_v19, %v1560_v24 }
 0x84d   : > { %v1564_v27 = vadd.f32 %v1561_v26, %v2323_v43 }
 0x84f   : > { %1566 = vst.msk [vmem:[%s2398_s13 + $0x8] sm:$0xff] %vm668_vm1, %v1564_v27 }
 0x850 PF: > { %s2420_s29 = sld [smem:[#allocation3_spill]] }
 0x851   : > { %s2421_s25 = sld [smem:[#allocation2_spill]] }
 0x852   : > { %s2422_s26 = sld [smem:[#allocation4_spill]] }
 0x856   : > { %s23_s27 = sadd.s32 1, %s2420_s29  }
 0x857   : > { %p20_p6 = scmp.ge.s32.totalorder %s23_s27, 4  }
 0x859   :  { %22 = sbr.rel (!%p20_p6) target bundleno = 4 (0x4), region = 142 }

</bundles_post_ra>
